<compile_context>
chip_gen: v5e
topology: v5e:2x2
jax: 0.10.0
libtpu: 0.0.40
codegen_flags: <defaults>
</compile_context>

<pallas_src>
import math

import jax
import jax.numpy as jnp
from jax.experimental import pallas as pl
from jax.experimental.pallas import tpu as pltpu


def _round_up(a: int, b: int) -> int:
    return (a + b - 1) // b * b


# ----------------------------- Pallas kernels ------------------------------ #

def _tconv_stats_kernel(x_ref, w_ref, o_ref, s0_ref, s1_ref):
    """One M-tile of the phase-space transposed conv + per-tile BN partial stats.

    x_ref : (TM, K)       bf16  im2col'd activations (taps x Cin)
    w_ref : (K, NCOL)     bf16  phase-grouped weights (resident across the grid)
    o_ref : (TM, NCOL)    f32   conv output, columns ordered (phase_y, phase_x, cout)
    s0_ref: (1, 1, NCOL)  f32   per-column sum for this tile
    s1_ref: (1, 1, NCOL)  f32   per-column sum of squares for this tile
    """
    y = jnp.dot(x_ref[...], w_ref[...], preferred_element_type=jnp.float32)
    o_ref[...] = y
    s0_ref[0] = jnp.sum(y, axis=0, keepdims=True)
    s1_ref[0] = jnp.sum(y * y, axis=0, keepdims=True)


def _bn_relu_kernel(y_ref, scale_ref, shift_ref, o_ref):
    """Fused BatchNorm affine (precomputed per-lane scale/shift) + ReLU, lane-dense."""
    o_ref[...] = jnp.maximum(y_ref[...] * scale_ref[...] + shift_ref[...], 0.0)


# ------------------------------- wrapper ----------------------------------- #

def basic_deconv_bn_relu(x_nchw, weight, gamma, beta, stride, eps=1e-5):
    """BasicDeconv forward, activate='bn':
       ConvTranspose2d(stride, padding=0, bias=False) -> BatchNorm2d (train-mode stats) -> ReLU.

    x_nchw : (N, Cin, H, W)
    weight : (Cin, Cout, kH, kW)   (PyTorch ConvTranspose2d layout)
    gamma, beta : (Cout,)
    Returns NCHW output of shape (N, Cout, (H-1)*stride+kH, (W-1)*stride+kW).
    """
    N, Cin, H, W = map(int, x_nchw.shape)
    Cin_w, Cout, kH, kW = map(int, weight.shape)
    assert Cin_w == Cin
    s = int(stride)
    Hout = (H - 1) * s + kH
    Wout = (W - 1) * s + kW

    # Sub-pixel decomposition sizes: each output phase (py, px) needs TkH x TkW input taps.
    TkH = -(-kH // s)
    TkW = -(-kW // s)
    Hp = H - 1 + TkH            # phase-plane height (= ceil(Hout / s))
    Wp = W - 1 + TkW
    Kdim = TkH * TkW * Cin      # matmul reduction dim

    # Pad Cout so the stored lane dim s*s*Cout_p is a multiple of 128 (lane-dense stores).
    g = 128 // math.gcd(128, s * s)
    Cout_p = _round_up(Cout, g)
    Ncol = s * s * Cout_p

    # ---- XLA layout plumbing: NCHW -> NHWC (bf16), halo pad, gather the TkH x TkW taps ----
    x = jnp.transpose(x_nchw, (0, 2, 3, 1)).astype(jnp.bfloat16)
    x_pad = jnp.pad(x, ((0, 0), (TkH - 1, TkH - 1), (TkW - 1, TkW - 1), (0, 0)))
    cols = []
    for t in range(TkH):
        for u in range(TkW):
            cols.append(x_pad[:, TkH - 1 - t: TkH - 1 - t + Hp,
                              TkW - 1 - u: TkW - 1 - u + Wp, :])
    xcat = jnp.concatenate(cols, axis=-1).reshape(N * Hp * Wp, Kdim)

    # ---- phase-grouped weights: rows (t, u, ci), cols (py, px, co); zero-filled padding ----
    wq = jnp.zeros((TkH, TkW, Cin, s, s, Cout_p), jnp.float32)
    wf = weight.astype(jnp.float32)
    for t in range(TkH):
        for py in range(s):
            ki = py + t * s
            if ki >= kH:
                continue
            for u in range(TkW):
                for px in range(s):
                    kj = px + u * s
                    if kj >= kW:
                        continue
                    wq = wq.at[t, u, :, py, px, :Cout].set(wf[:, :, ki, kj])
    w2d = wq.reshape(Kdim, Ncol).astype(jnp.bfloat16)

    # ---- tile M' (rows = N*Hp*Wp phase-plane pixels), pad to a whole number of tiles ----
    Mp = N * Hp * Wp
    TM = max(8, min(1024, (2 * 1024 * 1024) // (Ncol * 4)))   # ~2 MiB f32 output tile
    TM = (TM // 8) * 8
    TM = min(TM, _round_up(Mp, 8))
    M_pad = _round_up(Mp, TM)
    grid_m = M_pad // TM
    xcat = jnp.pad(xcat, ((0, M_pad - Mp), (0, 0)))

    vmem1 = 2 * (TM * Kdim * 2 + Kdim * Ncol * 2 + TM * Ncol * 4 + 2 * Ncol * 4)
    conv_out, psum, psumsq = pl.pallas_call(
        _tconv_stats_kernel,
        out_shape=(jax.ShapeDtypeStruct((M_pad, Ncol), jnp.float32),
                   jax.ShapeDtypeStruct((grid_m, 1, Ncol), jnp.float32),
                   jax.ShapeDtypeStruct((grid_m, 1, Ncol), jnp.float32)),
        grid=(grid_m,),
        in_specs=[pl.BlockSpec((TM, Kdim), lambda i: (i, 0)),
                  pl.BlockSpec((Kdim, Ncol), lambda i: (0, 0))],
        out_specs=(pl.BlockSpec((TM, Ncol), lambda i: (i, 0)),
                   pl.BlockSpec((1, 1, Ncol), lambda i: (i, 0, 0)),
                   pl.BlockSpec((1, 1, Ncol), lambda i: (i, 0, 0))),
        compiler_params=pltpu.CompilerParams(
            dimension_semantics=("parallel",),
            vmem_limit_bytes=int(min(56 << 20, max(16 << 20, 2 * vmem1)))),
    )(xcat, w2d)

    # ---- BatchNorm batch statistics (biased var, PyTorch train-mode normalization) ----
    # All out-of-range / padded entries of conv_out are exactly zero, so folding the
    # per-column sums over the s*s phases gives exact per-channel sums over N*Hout*Wout pixels.
    sum_c = psum.sum(axis=(0, 1)).reshape(s * s, Cout_p).sum(axis=0)       # (Cout_p,)
    sumsq_c = psumsq.sum(axis=(0, 1)).reshape(s * s, Cout_p).sum(axis=0)   # (Cout_p,)
    count = jnp.float32(N * Hout * Wout)
    mean = sum_c / count
    var = sumsq_c / count - mean * mean
    inv = jax.lax.rsqrt(var + jnp.float32(eps))
    gamma_p = jnp.zeros((Cout_p,), jnp.float32).at[:Cout].set(gamma.astype(jnp.float32))
    beta_p = jnp.zeros((Cout_p,), jnp.float32).at[:Cout].set(beta.astype(jnp.float32))
    scale_c = gamma_p * inv
    shift_c = beta_p - mean * scale_c
    scale = jnp.tile(scale_c, s * s).reshape(1, Ncol)   # column order is (py, px, co)
    shift = jnp.tile(shift_c, s * s).reshape(1, Ncol)

    vmem2 = 2 * (2 * TM * Ncol * 4) + 4 * Ncol * 4
    out2d = pl.pallas_call(
        _bn_relu_kernel,
        out_shape=jax.ShapeDtypeStruct((M_pad, Ncol), jnp.float32),
        grid=(grid_m,),
        in_specs=[pl.BlockSpec((TM, Ncol), lambda i: (i, 0)),
                  pl.BlockSpec((1, Ncol), lambda i: (0, 0)),
                  pl.BlockSpec((1, Ncol), lambda i: (0, 0))],
        out_specs=pl.BlockSpec((TM, Ncol), lambda i: (i, 0)),
        compiler_params=pltpu.CompilerParams(
            dimension_semantics=("parallel",),
            vmem_limit_bytes=int(min(56 << 20, max(16 << 20, 2 * vmem2)))),
    )(conv_out, scale, shift)

    # ---- XLA layout plumbing: interleave output phases, crop padding, back to NCHW ----
    y = out2d[:Mp].reshape(N, Hp, Wp, s, s, Cout_p)            # (n, r, c, py, px, co)
    y = jnp.transpose(y, (0, 1, 3, 2, 4, 5)).reshape(N, Hp * s, Wp * s, Cout_p)
    y = y[:, :Hout, :Wout, :Cout]
    return jnp.transpose(y, (0, 3, 1, 2))


# ------------------------------ reference ----------------------------------- #

def _reference(x_nchw, weight, gamma, beta, stride, eps=1e-5):
    """Pure-jnp reference (uses the same bf16-rounded matmul inputs as the kernel path)."""
    x = x_nchw.astype(jnp.bfloat16).astype(jnp.float32)
    w = weight.astype(jnp.bfloat16).astype(jnp.float32)
    N, Cin, H, W = x.shape
    _, Cout, kH, kW = w.shape
    s = int(stride)
    Hout = (H - 1) * s + kH
    Wout = (W - 1) * s + kW
    z = jnp.einsum('ncij,cokl->noijkl', x, w, precision=jax.lax.Precision.HIGHEST)
    y = jnp.zeros((N, Cout, Hout, Wout), jnp.float32)
    for ki in range(kH):
        for kj in range(kW):
            y = y.at[:, :, ki:ki + (H - 1) * s + 1:s,
                     kj:kj + (W - 1) * s + 1:s].add(z[:, :, :, :, ki, kj])
    mean = y.mean(axis=(0, 2, 3), keepdims=True)
    var = y.var(axis=(0, 2, 3), keepdims=True)     # biased var, PyTorch train-mode
    out = (y - mean) * jax.lax.rsqrt(var + eps)
    out = out * gamma.reshape(1, -1, 1, 1) + beta.reshape(1, -1, 1, 1)
    return jnp.maximum(out, 0.0)


if __name__ == "__main__":
    key = jax.random.PRNGKey(0)
    k1, k2, k3, k4 = jax.random.split(key, 4)

    # BasicDeconv(4, 8, kernel_size=3, stride=2, activate='bn')
    N, Cin, H, W = 2, 4, 16, 16
    Cout, ksize, stride = 8, 3, 2

    x = jax.random.normal(k1, (N, Cin, H, W), jnp.float32)
    # ConvTranspose2d.weight shape: (in_channels, out_channels, kH, kW); bias=False for 'bn'
    weight = 0.1 * jax.random.normal(k2, (Cin, Cout, ksize, ksize), jnp.float32)
    gamma = 1.0 + 0.1 * jax.random.normal(k3, (Cout,), jnp.float32)
    beta = 0.1 * jax.random.normal(k4, (Cout,), jnp.float32)

    fn = jax.jit(basic_deconv_bn_relu, static_argnums=(4,))
    out = fn(x, weight, gamma, beta, stride)
    out = jax.block_until_ready(out)

    Hout = (H - 1) * stride + ksize
    Wout = (W - 1) * stride + ksize
    assert out.shape == (N, Cout, Hout, Wout), out.shape

    ref = _reference(x, weight, gamma, beta, stride)
    err = float(jnp.max(jnp.abs(out - ref)))
    assert err < 2e-3, f"max abs error vs reference: {err}"

    print("KERNEL_OK")
</pallas_src>

<mosaic_0001>
module attributes {stable_mosaic.version = 11 : i64} {
  func.func @_tconv_stats_kernel(%arg0: i32, %arg1: memref<584x16xbf16, #tpu.memory_space<vmem>>, %arg2: memref<16x128xbf16, #tpu.memory_space<vmem>>, %arg3: memref<584x128xf32, #tpu.memory_space<vmem>>, %arg4: memref<1x1x128xf32, #tpu.memory_space<vmem>>, %arg5: memref<1x1x128xf32, #tpu.memory_space<vmem>>) attributes {dimension_semantics = [#tpu.dimension_semantics<parallel>], iteration_bounds = array<i64: 1>, scalar_prefetch = 0 : i64, scratch_operands = 0 : i64, tpu.core_type = #tpu.core_type<tc>, window_params = [{transform_indices = @transform_0, window_bounds = array<i64: 584, 16>}, {pipeline_mode = #tpu.pipeline_mode<synchronous>, transform_indices = @transform_1, window_bounds = array<i64: 16, 128>}, {transform_indices = @transform_2, window_bounds = array<i64: 584, 128>}, {transform_indices = @transform_3, window_bounds = array<i64: 1, 1, 128>}, {transform_indices = @transform_4, window_bounds = array<i64: 1, 1, 128>}]} {
    %c0 = arith.constant 0 : index
    %c0_0 = arith.constant 0 : index
    %0 = vector.load %arg1[%c0, %c0_0] : memref<584x16xbf16, #tpu.memory_space<vmem>>, vector<584x16xbf16>
    %c0_1 = arith.constant 0 : index
    %c0_2 = arith.constant 0 : index
    %1 = vector.load %arg2[%c0_1, %c0_2] : memref<16x128xbf16, #tpu.memory_space<vmem>>, vector<16x128xbf16>
    %cst = arith.constant dense<0.000000e+00> : vector<584x128xf32>
    %2 = tpu.matmul %0, %1, %cst {dimension_numbers = #tpu.dot_dimension_numbers<[1], [0], [0], [1], [0, 0, 1, 1], [], []>} : vector<584x16xbf16>, vector<16x128xbf16>, vector<584x128xf32> -> vector<584x128xf32>
    %c0_3 = arith.constant 0 : index
    %c0_4 = arith.constant 0 : index
    %3 = vector.load %arg3[%c0_3, %c0_4] : memref<584x128xf32, #tpu.memory_space<vmem>>, vector<584x128xf32>
    tpu.vector_store %arg3[%c0_3, %c0_4], %2 {strides = array<i32>} : memref<584x128xf32, #tpu.memory_space<vmem>>, vector<584x128xf32>,
    %cst_5 = arith.constant dense<0.000000e+00> : vector<128xf32>
    %4 = vector.multi_reduction <add>, %2, %cst_5 [0] : vector<584x128xf32> to vector<128xf32>
    %5 = vector.shape_cast %4 : vector<128xf32> to vector<1x128xf32>
    %c0_6 = arith.constant 0 : index
    %c0_7 = arith.constant 0 : index
    %c0_8 = arith.constant 0 : index
    %6 = vector.load %arg4[%c0_6, %c0_7, %c0_8] : memref<1x1x128xf32, #tpu.memory_space<vmem>>, vector<1x1x128xf32>
    %7 = vector.shape_cast %6 : vector<1x1x128xf32> to vector<1x128xf32>
    %8 = vector.shape_cast %5 : vector<1x128xf32> to vector<1x1x128xf32>
    tpu.vector_store %arg4[%c0_6, %c0_7, %c0_8], %8 {strides = array<i32>} : memref<1x1x128xf32, #tpu.memory_space<vmem>>, vector<1x1x128xf32>,
    %9 = arith.mulf %2, %2 : vector<584x128xf32>
    %cst_9 = arith.constant dense<0.000000e+00> : vector<128xf32>
    %10 = vector.multi_reduction <add>, %9, %cst_9 [0] : vector<584x128xf32> to vector<128xf32>
    %11 = vector.shape_cast %10 : vector<128xf32> to vector<1x128xf32>
    %c0_10 = arith.constant 0 : index
    %c0_11 = arith.constant 0 : index
    %c0_12 = arith.constant 0 : index
    %12 = vector.load %arg5[%c0_10, %c0_11, %c0_12] : memref<1x1x128xf32, #tpu.memory_space<vmem>>, vector<1x1x128xf32>
    %13 = vector.shape_cast %12 : vector<1x1x128xf32> to vector<1x128xf32>
    %14 = vector.shape_cast %11 : vector<1x128xf32> to vector<1x1x128xf32>
    tpu.vector_store %arg5[%c0_10, %c0_11, %c0_12], %14 {strides = array<i32>} : memref<1x1x128xf32, #tpu.memory_space<vmem>>, vector<1x1x128xf32>,
    return
  }
  func.func @transform_0(%arg0: i32) -> (i32, i32) {
    %c0_i32 = arith.constant 0 : i32
    %c0_i32_0 = arith.constant 0 : i32
    return %arg0, %c0_i32 : i32, i32
  }
  func.func @transform_1(%arg0: i32) -> (i32, i32) {
    %c0_i32 = arith.constant 0 : i32
    %c0_i32_0 = arith.constant 0 : i32
    %c0_i32_1 = arith.constant 0 : i32
    return %c0_i32, %c0_i32_0 : i32, i32
  }
  func.func @transform_2(%arg0: i32) -> (i32, i32) {
    %c0_i32 = arith.constant 0 : i32
    %c0_i32_0 = arith.constant 0 : i32
    return %arg0, %c0_i32 : i32, i32
  }
  func.func @transform_3(%arg0: i32) -> (i32, i32, i32) {
    %c0_i32 = arith.constant 0 : i32
    %c0_i32_0 = arith.constant 0 : i32
    %c0_i32_1 = arith.constant 0 : i32
    return %arg0, %c0_i32, %c0_i32_0 : i32, i32, i32
  }
  func.func @transform_4(%arg0: i32) -> (i32, i32, i32) {
    %c0_i32 = arith.constant 0 : i32
    %c0_i32_0 = arith.constant 0 : i32
    %c0_i32_1 = arith.constant 0 : i32
    return %arg0, %c0_i32, %c0_i32_0 : i32, i32, i32
  }
}

module attributes {stable_mosaic.version = 11 : i64} {
  func.func @_bn_relu_kernel(%arg0: i32, %arg1: memref<584x128xf32, #tpu.memory_space<vmem>>, %arg2: memref<1x128xf32, #tpu.memory_space<vmem>>, %arg3: memref<1x128xf32, #tpu.memory_space<vmem>>, %arg4: memref<584x128xf32, #tpu.memory_space<vmem>>) attributes {dimension_semantics = [#tpu.dimension_semantics<parallel>], iteration_bounds = array<i64: 1>, scalar_prefetch = 0 : i64, scratch_operands = 0 : i64, tpu.core_type = #tpu.core_type<tc>, window_params = [{transform_indices = @transform_0, window_bounds = array<i64: 584, 128>}, {pipeline_mode = #tpu.pipeline_mode<synchronous>, transform_indices = @transform_1, window_bounds = array<i64: 1, 128>}, {pipeline_mode = #tpu.pipeline_mode<synchronous>, transform_indices = @transform_2, window_bounds = array<i64: 1, 128>}, {transform_indices = @transform_3, window_bounds = array<i64: 584, 128>}]} {
    %c0 = arith.constant 0 : index
    %c0_0 = arith.constant 0 : index
    %0 = vector.load %arg1[%c0, %c0_0] : memref<584x128xf32, #tpu.memory_space<vmem>>, vector<584x128xf32>
    %c0_1 = arith.constant 0 : index
    %c0_2 = arith.constant 0 : index
    %1 = vector.load %arg2[%c0_1, %c0_2] : memref<1x128xf32, #tpu.memory_space<vmem>>, vector<1x128xf32>
    %2 = vector.broadcast %1 : vector<1x128xf32> to vector<584x128xf32>
    %3 = arith.mulf %0, %2 : vector<584x128xf32>
    %c0_3 = arith.constant 0 : index
    %c0_4 = arith.constant 0 : index
    %4 = vector.load %arg3[%c0_3, %c0_4] : memref<1x128xf32, #tpu.memory_space<vmem>>, vector<1x128xf32>
    %5 = vector.broadcast %4 : vector<1x128xf32> to vector<584x128xf32>
    %6 = arith.addf %3, %5 : vector<584x128xf32>
    %cst = arith.constant 0.000000e+00 : f32
    %7 = vector.broadcast %cst : f32 to vector<584x128xf32>
    %8 = arith.maximumf %6, %7 : vector<584x128xf32>
    %c0_5 = arith.constant 0 : index
    %c0_6 = arith.constant 0 : index
    %9 = vector.load %arg4[%c0_5, %c0_6] : memref<584x128xf32, #tpu.memory_space<vmem>>, vector<584x128xf32>
    tpu.vector_store %arg4[%c0_5, %c0_6], %8 {strides = array<i32>} : memref<584x128xf32, #tpu.memory_space<vmem>>, vector<584x128xf32>,
    return
  }
  func.func @transform_0(%arg0: i32) -> (i32, i32) {
    %c0_i32 = arith.constant 0 : i32
    %c0_i32_0 = arith.constant 0 : i32
    return %arg0, %c0_i32 : i32, i32
  }
  func.func @transform_1(%arg0: i32) -> (i32, i32) {
    %c0_i32 = arith.constant 0 : i32
    %c0_i32_0 = arith.constant 0 : i32
    %c0_i32_1 = arith.constant 0 : i32
    return %c0_i32, %c0_i32_0 : i32, i32
  }
  func.func @transform_2(%arg0: i32) -> (i32, i32) {
    %c0_i32 = arith.constant 0 : i32
    %c0_i32_0 = arith.constant 0 : i32
    %c0_i32_1 = arith.constant 0 : i32
    return %c0_i32, %c0_i32_0 : i32, i32
  }
  func.func @transform_3(%arg0: i32) -> (i32, i32) {
    %c0_i32 = arith.constant 0 : i32
    %c0_i32_0 = arith.constant 0 : i32
    return %arg0, %c0_i32 : i32, i32
  }
}

</mosaic_0001>

<bundles_post_ra>
// kernel: tile.18
= control target key start
LH: loop header
LB: loop body
LE: loop exit
PB: predicated region body
PF: predicated region fallthrough
CT: control target
= control target key end

     0   :  { %s22_s0 = inlined_call_operand.vmem [shape: f32[32], index: 0, kind: input, shape index: {}]   ;;  %s23_s1 = inlined_call_operand.vmem [shape: f32[4,32], index: 1, kind: output, shape index: {}]  }
   0x1   :  { %v4_v0 = vld [vmem:[%s22_s0] ss:$0 sm:$0xff] }
   0x2   :  { %5 = vst [vmem:[%s23_s1] sm:$0xf] %v4_v0 }

// kernel: tile.19
= control target key start
LH: loop header
LB: loop body
LE: loop exit
PB: predicated region body
PF: predicated region fallthrough
CT: control target
= control target key end

     0   :  { %s37_s8 = smov 32   ;;  %s38_s9 = smov 64   ;;  %vm7_vm0 = vcmask 261120   ;;  %vm13_vm1 = vcmask 1048320   ;;  %vm19_vm2 = vcmask 785920   ;;  %vm25_vm3 = vcmask 523520   ;;  %s55_s0 = inlined_call_operand.vmem [shape: f32[4,32], index: 0, kind: input, shape index: {}]   ;;  %s56_s1 = inlined_call_operand.vmem [shape: f32[1,128], index: 1, kind: output, shape index: {}]  }
   0x1   :  { %v4_v0 = vld [vmem:[%s55_s0] sm:$0xf]  ;;  %s36_s0 = smov 96  }
   0x2   :  { %5 = vst [vmem:[#allocation1] sm:$0xf] %v4_v0 }
   0x9   :  { %v10_v1 = vld [vmem:[#allocation1 + $0x3] sm:$0x1]   ;;  %v22_v2 = vld [vmem:[#allocation1 + $0x1] sm:$0x1]   ;;  %v16_v3 = vld [vmem:[#allocation1 + $0x2] sm:$0x1]  }
   0xa   :  { %11 = vrot.lane.b32.xlu0 %v10_v1, %s36_s0  ;;  %23 = vrot.lane.b32.xlu1 %v22_v2, %s37_s8  ;;  %v6_v4 = vld [vmem:[#allocation1] sm:$0x1]  }
   0xb   :  { %8 = vst.msk [vmem:[#allocation0] sm:$0x1] %vm7_vm0, %v6_v4  }
  0x12   :  { %17 = vrot.lane.b32.xlu0 %v16_v3, %s38_s9 }
  0x7c   :  { %v12_v5 = vpop.permute.xlu0 %11   ;;  %v24_v6 = vpop.permute.xlu1 %23  }
  0x7d   :  { %14 = vst.msk [vmem:[#allocation0] sm:$0x1] %vm13_vm1, %v12_v5  }
  0x84   :  { %v18_v7 = vpop.permute.xlu0 %17  }
  0x85   :  { %20 = vst.msk [vmem:[#allocation0] sm:$0x1] %vm19_vm2, %v18_v7  }
  0x86   :  { %26 = vst.msk [vmem:[#allocation0] sm:$0x1] %vm25_vm3, %v24_v6  }
  0x8d   :  { %v29_v8 = vld [vmem:[#allocation0] sm:$0x1] }
  0x8e   :  { %32 = vst [vmem:[%s56_s1] sm:$0x1] %v29_v8 }

// kernel: basic_deconv_bn_relu.3
= control target key start
LH: loop header
LB: loop body
LE: loop exit
PB: predicated region body
PF: predicated region fallthrough
CT: control target
= control target key end

     0   :  { %s1046_s0 = inlined_call_operand.vmem [shape: f32[584,128], index: 0, kind: input, shape index: {}]   ;;  %s1047_s1 = inlined_call_operand.vmem [shape: f32[1,128], index: 1, kind: input, shape index: {}]   ;;  %s1048_s2 = inlined_call_operand.vmem [shape: f32[1,128], index: 2, kind: input, shape index: {}]   ;;  %s1049_s3 = inlined_call_operand.vmem [shape: f32[584,128], index: 3, kind: output, shape index: {}]  }
   0x1   :  { %v14_v0 = vld [vmem:[%s1046_s0] sm:$0xff]  ;;  %v15_v3 = vld [vmem:[%s1046_s0 + $0x8] sm:$0xff]  ;;  %v16_v6 = vld [vmem:[%s1046_s0 + $0x10] sm:$0xff] }
   0x2   :  { %v419_v1 = vld [vmem:[%s1047_s1] ss:$0 sm:$0xff]  ;;  %v17_v7 = vld [vmem:[%s1046_s0 + $0x18] sm:$0xff]  ;;  %v19_v12 = vld [vmem:[%s1046_s0 + $0x28] sm:$0xff] }
   0x3   :  { %v424_v2 = vld [vmem:[%s1048_s2] ss:$0 sm:$0xff]  ;;  %v91_v4 = vmul.f32 %v419_v1, %v14_v0  ;;  %v92_v5 = vmul.f32 %v419_v1, %v15_v3  ;;  %v93_v9 = vmul.f32 %v419_v1, %v16_v6  ;;  %v94_v10 = vmul.f32 %v419_v1, %v17_v7  ;;  %v20_v13 = vld [vmem:[%s1046_s0 + $0x30] sm:$0xff]  ;;  %v21_v14 = vld [vmem:[%s1046_s0 + $0x38] sm:$0xff] }
   0x4   :  { %v18_v8 = vld [vmem:[%s1046_s0 + $0x20] sm:$0xff]  ;;  %v96_v17 = vmul.f32 %v419_v1, %v19_v12  ;;  %v97_v18 = vmul.f32 %v419_v1, %v20_v13  ;;  %v98_v22 = vmul.f32 %v419_v1, %v21_v14  ;;  %v23_v24 = vld [vmem:[%s1046_s0 + $0x48] sm:$0xff]  ;;  %v24_v29 = vld [vmem:[%s1046_s0 + $0x50] sm:$0xff] }
   0x5   :  { %v95_v11 = vmul.f32 %v419_v1, %v18_v8  ;;  %v168_v15 = vadd.f32 %v424_v2, %v91_v4  ;;  %v169_v16 = vadd.f32 %v424_v2, %v92_v5  ;;  %v170_v19 = vadd.f32 %v424_v2, %v93_v9  ;;  %v22_v23 = vld [vmem:[%s1046_s0 + $0x40] sm:$0xff]  ;;  %v25_v30 = vld [vmem:[%s1046_s0 + $0x58] sm:$0xff]  ;;  %v27_v35 = vld [vmem:[%s1046_s0 + $0x68] sm:$0xff] }
   0x6   :  { %v171_v20 = vadd.f32 %v424_v2, %v94_v10  ;;  %v173_v27 = vadd.f32 %v424_v2, %v96_v17  ;;  %v174_v28 = vadd.f32 %v424_v2, %v97_v18  ;;  %v26_v31 = vld [vmem:[%s1046_s0 + $0x60] sm:$0xff]  ;;  %v175_v34 = vadd.f32 %v424_v2, %v98_v22  ;;  %v28_v36 = vld [vmem:[%s1046_s0 + $0x70] sm:$0xff]  ;;  %v29_v41 = vld [vmem:[%s1046_s0 + $0x78] sm:$0xff] }
   0x7   :  { %v172_v21 = vadd.f32 %v424_v2, %v95_v11  ;;  %v241_v25 = vmax.f32 %v168_v15, 0.0  ;;  %v242_v26 = vmax.f32 %v169_v16, 0.0  ;;  %v243_v32 = vmax.f32 %v170_v19, 0.0  ;;  %v30_v54 = vld [vmem:[%s1046_s0 + $0x80] sm:$0xff]  ;;  %v31_v55 = vld [vmem:[%s1046_s0 + $0x88] sm:$0xff]  ;;  %v32_v58 = vld [vmem:[%s1046_s0 + $0x90] sm:$0xff] }
   0x8   :  { %v244_v33 = vmax.f32 %v171_v20, 0.0  ;;  %v246_v38 = vmax.f32 %v173_v27, 0.0  ;;  %v99_v39 = vmul.f32 %v419_v1, %v22_v23  ;;  %v100_v40 = vmul.f32 %v419_v1, %v23_v24  ;;  %v33_v59 = vld [vmem:[%s1046_s0 + $0x98] sm:$0xff]  ;;  %v34_v62 = vld [vmem:[%s1046_s0 + $0xa0] sm:$0xff]  ;;  %v35_v5 = vld [vmem:[%s1046_s0 + $0xa8] sm:$0xff] }
   0x9   :  { %314 = vst [vmem:[%s1049_s3] sm:$0xff] %v241_v25  ;;  %v245_v37 = vmax.f32 %v172_v21, 0.0  ;;  %v247_v42 = vmax.f32 %v174_v28, 0.0  ;;  %v101_v43 = vmul.f32 %v419_v1, %v24_v29  ;;  %v102_v44 = vmul.f32 %v419_v1, %v25_v30  ;;  %v36_v10 = vld [vmem:[%s1046_s0 + $0xb0] sm:$0xff]  ;;  %v37_v14 = vld [vmem:[%s1046_s0 + $0xb8] sm:$0xff]  ;;  %v38_v18 = vld [vmem:[%s1046_s0 + $0xc0] sm:$0xff] }
   0xa   :  { %315 = vst [vmem:[%s1049_s3 + $0x8] sm:$0xff] %v242_v26  ;;  %v103_v45 = vmul.f32 %v419_v1, %v26_v31  ;;  %v176_v46 = vadd.f32 %v424_v2, %v99_v39  ;;  %v177_v47 = vadd.f32 %v424_v2, %v100_v40  ;;  %v104_v48 = vmul.f32 %v419_v1, %v27_v35  ;;  %v39_v22 = vld [vmem:[%s1046_s0 + $0xc8] sm:$0xff]  ;;  %v40_v26 = vld [vmem:[%s1046_s0 + $0xd0] sm:$0xff]  ;;  %v41_v30 = vld [vmem:[%s1046_s0 + $0xd8] sm:$0xff] }
   0xb   :  { %316 = vst [vmem:[%s1049_s3 + $0x10] sm:$0xff] %v243_v32  ;;  %v105_v49 = vmul.f32 %v419_v1, %v28_v36  ;;  %v248_v50 = vmax.f32 %v175_v34, 0.0  ;;  %v178_v51 = vadd.f32 %v424_v2, %v101_v43  ;;  %v179_v52 = vadd.f32 %v424_v2, %v102_v44  ;;  %v42_v34 = vld [vmem:[%s1046_s0 + $0xe0] sm:$0xff] }
   0xc   :  { %317 = vst [vmem:[%s1049_s3 + $0x18] sm:$0xff] %v244_v33  ;;  %v106_v53 = vmul.f32 %v419_v1, %v29_v41  ;;  %v249_v56 = vmax.f32 %v176_v46, 0.0  ;;  %v180_v57 = vadd.f32 %v424_v2, %v103_v45  ;;  %v250_v60 = vmax.f32 %v177_v47, 0.0  ;;  %v45_v46 = vld [vmem:[%s1046_s0 + $0xf8] sm:$0xff] }
   0xd   :  { %318 = vst [vmem:[%s1049_s3 + $0x20] sm:$0xff] %v245_v37  ;;  %v181_v61 = vadd.f32 %v424_v2, %v104_v48  ;;  %v251_v63 = vmax.f32 %v178_v51, 0.0  ;;  %v182_v0 = vadd.f32 %v424_v2, %v105_v49  ;;  %v107_v3 = vmul.f32 %v419_v1, %v30_v54  ;;  %v47_v51 = vld [vmem:[%s1046_s0 + $0x108] sm:$0xff] }
   0xe   :  { %319 = vst [vmem:[%s1049_s3 + $0x28] sm:$0xff] %v246_v38  ;;  %v108_v4 = vmul.f32 %v419_v1, %v31_v55  ;;  %v252_v6 = vmax.f32 %v179_v52, 0.0  ;;  %v183_v7 = vadd.f32 %v424_v2, %v106_v53  ;;  %v109_v8 = vmul.f32 %v419_v1, %v32_v58  ;;  %v43_v38 = vld [vmem:[%s1046_s0 + $0xe8] sm:$0xff]  ;;  %v48_v55 = vld [vmem:[%s1046_s0 + $0x110] sm:$0xff] }
   0xf   :  { %320 = vst [vmem:[%s1049_s3 + $0x30] sm:$0xff] %v247_v42  ;;  %v110_v9 = vmul.f32 %v419_v1, %v33_v59  ;;  %v253_v11 = vmax.f32 %v180_v57, 0.0  ;;  %v184_v12 = vadd.f32 %v424_v2, %v107_v3  ;;  %v111_v13 = vmul.f32 %v419_v1, %v34_v62  ;;  %v44_v42 = vld [vmem:[%s1046_s0 + $0xf0] sm:$0xff]  ;;  %v49_v59 = vld [vmem:[%s1046_s0 + $0x118] sm:$0xff] }
  0x10   :  { %321 = vst [vmem:[%s1049_s3 + $0x38] sm:$0xff] %v248_v50  ;;  %v254_v15 = vmax.f32 %v181_v61, 0.0  ;;  %v185_v16 = vadd.f32 %v424_v2, %v108_v4  ;;  %v112_v17 = vmul.f32 %v419_v1, %v35_v5  ;;  %v255_v19 = vmax.f32 %v182_v0, 0.0  ;;  %v46_v50 = vld [vmem:[%s1046_s0 + $0x100] sm:$0xff] }
  0x11   :  { %322 = vst [vmem:[%s1049_s3 + $0x40] sm:$0xff] %v249_v56  ;;  %v186_v20 = vadd.f32 %v424_v2, %v109_v8  ;;  %v113_v21 = vmul.f32 %v419_v1, %v36_v10  ;;  %v256_v23 = vmax.f32 %v183_v7, 0.0  ;;  %v187_v24 = vadd.f32 %v424_v2, %v110_v9  ;;  %v50_v5 = vld [vmem:[%s1046_s0 + $0x120] sm:$0xff]  ;;  %v51_v9 = vld [vmem:[%s1046_s0 + $0x128] sm:$0xff]  ;;  %v52_v10 = vld [vmem:[%s1046_s0 + $0x130] sm:$0xff] }
  0x12   :  { %323 = vst [vmem:[%s1049_s3 + $0x48] sm:$0xff] %v250_v60  ;;  %v114_v25 = vmul.f32 %v419_v1, %v37_v14  ;;  %v257_v27 = vmax.f32 %v184_v12, 0.0  ;;  %v188_v28 = vadd.f32 %v424_v2, %v111_v13  ;;  %v115_v29 = vmul.f32 %v419_v1, %v38_v18 }
  0x13   :  { %324 = vst [vmem:[%s1049_s3 + $0x50] sm:$0xff] %v251_v63  ;;  %v258_v31 = vmax.f32 %v185_v16, 0.0  ;;  %v189_v32 = vadd.f32 %v424_v2, %v112_v17  ;;  %v116_v33 = vmul.f32 %v419_v1, %v39_v22  ;;  %v259_v35 = vmax.f32 %v186_v20, 0.0  ;;  %v53_v17 = vld [vmem:[%s1046_s0 + $0x138] sm:$0xff]  ;;  %v54_v22 = vld [vmem:[%s1046_s0 + $0x140] sm:$0xff] }
  0x14   :  { %325 = vst [vmem:[%s1049_s3 + $0x58] sm:$0xff] %v252_v6  ;;  %v190_v36 = vadd.f32 %v424_v2, %v113_v21  ;;  %v117_v37 = vmul.f32 %v419_v1, %v40_v26  ;;  %v260_v39 = vmax.f32 %v187_v24, 0.0  ;;  %v191_v40 = vadd.f32 %v424_v2, %v114_v25  ;;  %v55_v25 = vld [vmem:[%s1046_s0 + $0x148] sm:$0xff] }
  0x15   :  { %326 = vst [vmem:[%s1049_s3 + $0x60] sm:$0xff] %v253_v11  ;;  %v118_v41 = vmul.f32 %v419_v1, %v41_v30  ;;  %v261_v43 = vmax.f32 %v188_v28, 0.0  ;;  %v192_v44 = vadd.f32 %v424_v2, %v115_v29  ;;  %v119_v45 = vmul.f32 %v419_v1, %v42_v34  ;;  %v56_v28 = vld [vmem:[%s1046_s0 + $0x150] sm:$0xff]  ;;  %v57_v29 = vld [vmem:[%s1046_s0 + $0x158] sm:$0xff]  ;;  %v58_v30 = vld [vmem:[%s1046_s0 + $0x160] sm:$0xff] }
  0x16   :  { %327 = vst [vmem:[%s1049_s3 + $0x68] sm:$0xff] %v254_v15  ;;  %v262_v47 = vmax.f32 %v189_v32, 0.0  ;;  %v193_v48 = vadd.f32 %v424_v2, %v116_v33  ;;  %v120_v49 = vmul.f32 %v419_v1, %v43_v38  ;;  %v263_v52 = vmax.f32 %v190_v36, 0.0  ;;  %v60_v36 = vld [vmem:[%s1046_s0 + $0x170] sm:$0xff] }
  0x17   :  { %328 = vst [vmem:[%s1049_s3 + $0x70] sm:$0xff] %v255_v19  ;;  %v194_v53 = vadd.f32 %v424_v2, %v117_v37  ;;  %v121_v54 = vmul.f32 %v419_v1, %v44_v42  ;;  %v264_v56 = vmax.f32 %v191_v40, 0.0  ;;  %v195_v57 = vadd.f32 %v424_v2, %v118_v41  ;;  %v61_v37 = vld [vmem:[%s1046_s0 + $0x178] sm:$0xff] }
  0x18   :  { %329 = vst [vmem:[%s1049_s3 + $0x78] sm:$0xff] %v256_v23  ;;  %v122_v58 = vmul.f32 %v419_v1, %v45_v46  ;;  %v265_v60 = vmax.f32 %v192_v44, 0.0  ;;  %v196_v61 = vadd.f32 %v424_v2, %v119_v45  ;;  %v123_v62 = vmul.f32 %v419_v1, %v46_v50  ;;  %v62_v46 = vld [vmem:[%s1046_s0 + $0x180] sm:$0xff] }
  0x19   :  { %330 = vst [vmem:[%s1049_s3 + $0x80] sm:$0xff] %v257_v27  ;;  %v124_v63 = vmul.f32 %v419_v1, %v47_v51  ;;  %v266_v0 = vmax.f32 %v193_v48, 0.0  ;;  %v197_v3 = vadd.f32 %v424_v2, %v120_v49  ;;  %v125_v4 = vmul.f32 %v419_v1, %v48_v55 }
  0x1a   :  { %331 = vst [vmem:[%s1049_s3 + $0x88] sm:$0xff] %v258_v31  ;;  %v267_v6 = vmax.f32 %v194_v53, 0.0  ;;  %v198_v7 = vadd.f32 %v424_v2, %v121_v54  ;;  %v126_v8 = vmul.f32 %v419_v1, %v49_v59  ;;  %v268_v11 = vmax.f32 %v195_v57, 0.0  ;;  %v65_v59 = vld [vmem:[%s1046_s0 + $0x198] sm:$0xff] }
  0x1b   :  { %332 = vst [vmem:[%s1049_s3 + $0x90] sm:$0xff] %v259_v35  ;;  %v199_v12 = vadd.f32 %v424_v2, %v122_v58  ;;  %v269_v13 = vmax.f32 %v196_v61, 0.0  ;;  %v200_v14 = vadd.f32 %v424_v2, %v123_v62  ;;  %v201_v15 = vadd.f32 %v424_v2, %v124_v63  ;;  %v59_v35 = vld [vmem:[%s1046_s0 + $0x168] sm:$0xff]  ;;  %v64_v58 = vld [vmem:[%s1046_s0 + $0x190] sm:$0xff] }
  0x1c   :  { %333 = vst [vmem:[%s1049_s3 + $0x98] sm:$0xff] %v260_v39  ;;  %v127_v16 = vmul.f32 %v419_v1, %v50_v5  ;;  %v270_v18 = vmax.f32 %v197_v3, 0.0  ;;  %v202_v19 = vadd.f32 %v424_v2, %v125_v4  ;;  %v128_v20 = vmul.f32 %v419_v1, %v51_v9  ;;  %v67_v3 = vld [vmem:[%s1046_s0 + $0x1a8] sm:$0xff] }
  0x1d   :  { %334 = vst [vmem:[%s1049_s3 + $0xa0] sm:$0xff] %v261_v43  ;;  %v129_v21 = vmul.f32 %v419_v1, %v52_v10  ;;  %v271_v23 = vmax.f32 %v198_v7, 0.0  ;;  %v203_v24 = vadd.f32 %v424_v2, %v126_v8  ;;  %v272_v26 = vmax.f32 %v199_v12, 0.0  ;;  %v68_v8 = vld [vmem:[%s1046_s0 + $0x1b0] sm:$0xff] }
  0x1e   :  { %335 = vst [vmem:[%s1049_s3 + $0xa8] sm:$0xff] %v262_v47  ;;  %v130_v27 = vmul.f32 %v419_v1, %v53_v17  ;;  %v273_v31 = vmax.f32 %v200_v14, 0.0  ;;  %v274_v32 = vmax.f32 %v201_v15, 0.0  ;;  %v204_v33 = vadd.f32 %v424_v2, %v127_v16  ;;  %v63_v47 = vld [vmem:[%s1046_s0 + $0x188] sm:$0xff] }
  0x1f   :  { %336 = vst [vmem:[%s1049_s3 + $0xb0] sm:$0xff] %v263_v52  ;;  %v131_v34 = vmul.f32 %v419_v1, %v54_v22  ;;  %v275_v38 = vmax.f32 %v202_v19, 0.0  ;;  %v205_v39 = vadd.f32 %v424_v2, %v128_v20  ;;  %v206_v40 = vadd.f32 %v424_v2, %v129_v21 }
  0x20   :  { %337 = vst [vmem:[%s1049_s3 + $0xb8] sm:$0xff] %v264_v56  ;;  %v132_v41 = vmul.f32 %v419_v1, %v55_v25  ;;  %v276_v42 = vmax.f32 %v203_v24, 0.0  ;;  %v133_v43 = vmul.f32 %v419_v1, %v56_v28  ;;  %v134_v44 = vmul.f32 %v419_v1, %v57_v29  ;;  %v71_v24 = vld [vmem:[%s1046_s0 + $0x1c8] sm:$0xff]  ;;  %v78_v29 = vld [vmem:[%s1046_s0 + $0x200] sm:$0xff] }
  0x21   :  { %338 = vst [vmem:[%s1049_s3 + $0xc0] sm:$0xff] %v265_v60  ;;  %v135_v45 = vmul.f32 %v419_v1, %v58_v30  ;;  %v207_v48 = vadd.f32 %v424_v2, %v130_v27  ;;  %v136_v49 = vmul.f32 %v419_v1, %v59_v35  ;;  %v137_v50 = vmul.f32 %v419_v1, %v60_v36  ;;  %v66_v60 = vld [vmem:[%s1046_s0 + $0x1a0] sm:$0xff]  ;;  %v79_v30 = vld [vmem:[%s1046_s0 + $0x208] sm:$0xff]  ;;  %v80_v35 = vld [vmem:[%s1046_s0 + $0x210] sm:$0xff] }
  0x22   :  { %339 = vst [vmem:[%s1049_s3 + $0xc8] sm:$0xff] %v266_v0  ;;  %v138_v51 = vmul.f32 %v419_v1, %v61_v37  ;;  %v277_v52 = vmax.f32 %v204_v33, 0.0  ;;  %v208_v53 = vadd.f32 %v424_v2, %v131_v34  ;;  %v278_v54 = vmax.f32 %v205_v39, 0.0  ;;  %v81_v36 = vld [vmem:[%s1046_s0 + $0x218] sm:$0xff]  ;;  %v82_v37 = vld [vmem:[%s1046_s0 + $0x220] sm:$0xff] }
  0x23   :  { %340 = vst [vmem:[%s1049_s3 + $0xd0] sm:$0xff] %v267_v6  ;;  %v209_v55 = vadd.f32 %v424_v2, %v132_v41  ;;  %v139_v56 = vmul.f32 %v419_v1, %v62_v46  ;;  %v140_v57 = vmul.f32 %v419_v1, %v63_v47  ;;  %v279_v61 = vmax.f32 %v206_v40, 0.0 }
  0x24   :  { %341 = vst [vmem:[%s1049_s3 + $0xd8] sm:$0xff] %v268_v11  ;;  %v210_v62 = vadd.f32 %v424_v2, %v133_v43  ;;  %v211_v63 = vadd.f32 %v424_v2, %v134_v44  ;;  %v212_v0 = vadd.f32 %v424_v2, %v135_v45  ;;  %v280_v4 = vmax.f32 %v207_v48, 0.0  ;;  %v84_v43 = vld [vmem:[%s1046_s0 + $0x230] sm:$0xff]  ;;  %v85_v48 = vld [vmem:[%s1046_s0 + $0x238] sm:$0xff] }
  0x25   :  { %342 = vst [vmem:[%s1049_s3 + $0xe0] sm:$0xff] %v269_v13  ;;  %v789_v5 = vadd.f32 %v424_v2, %v136_v49  ;;  %v792_v6 = vadd.f32 %v424_v2, %v137_v50  ;;  %v795_v7 = vadd.f32 %v424_v2, %v138_v51  ;;  %v281_v9 = vmax.f32 %v208_v53, 0.0  ;;  %v77_v13 = vld [vmem:[%s1046_s0 + $0x1f8] sm:$0xff]  ;;  %v72_v50 = vld [vmem:[%s1046_s0 + $0x1d0] sm:$0xff] }
  0x26   :  { %343 = vst [vmem:[%s1049_s3 + $0xe8] sm:$0xff] %v270_v18  ;;  %v141_v10 = vmul.f32 %v419_v1, %v64_v58  ;;  %v142_v11 = vmul.f32 %v419_v1, %v65_v59  ;;  %v143_v12 = vmul.f32 %v419_v1, %v66_v60  ;;  %v282_v14 = vmax.f32 %v209_v55, 0.0  ;;  %v69_v18 = vld [vmem:[%s1046_s0 + $0x1b8] sm:$0xff]  ;;  %v74_v59 = vld [vmem:[%s1046_s0 + $0x1e0] sm:$0xff] }
  0x27   :  { %344 = vst [vmem:[%s1049_s3 + $0xf0] sm:$0xff] %v271_v23  ;;  %v813_v15 = vadd.f32 %v424_v2, %v139_v56  ;;  %v816_v16 = vadd.f32 %v424_v2, %v140_v57  ;;  %v144_v17 = vmul.f32 %v419_v1, %v67_v3  ;;  %v283_v19 = vmax.f32 %v210_v62, 0.0  ;;  %v70_v23 = vld [vmem:[%s1046_s0 + $0x1c0] sm:$0xff] }
  0x28   :  { %345 = vst [vmem:[%s1049_s3 + $0xf8] sm:$0xff] %v272_v26  ;;  %v284_v20 = vmax.f32 %v211_v63, 0.0  ;;  %v285_v21 = vmax.f32 %v212_v0, 0.0  ;;  %v145_v22 = vmul.f32 %v419_v1, %v68_v8  ;;  %v286_v25 = vmax.f32 %v789_v5, 0.0  ;;  %v86_v0 = vld [vmem:[%s1046_s0 + $0x240] sm:$0xff]  ;;  %v75_v5 = vld [vmem:[%s1046_s0 + $0x1e8] sm:$0xff] }
  0x29   :  { %346 = vst [vmem:[%s1049_s3 + $0x100] sm:$0xff] %v273_v31  ;;  %v287_v26 = vmax.f32 %v792_v6, 0.0  ;;  %v288_v27 = vmax.f32 %v795_v7, 0.0  ;;  %v154_v28 = vmul.f32 %v419_v1, %v77_v13  ;;  %v218_v31 = vadd.f32 %v424_v2, %v141_v10 }
  0x2a   :  { %347 = vst [vmem:[%s1049_s3 + $0x108] sm:$0xff] %v274_v32  ;;  %v850_v32 = vadd.f32 %v424_v2, %v142_v11  ;;  %v853_v33 = vadd.f32 %v424_v2, %v143_v12  ;;  %v146_v34 = vmul.f32 %v419_v1, %v69_v18  ;;  %v290_v39 = vmax.f32 %v816_v16, 0.0  ;;  %v76_v11 = vld [vmem:[%s1046_s0 + $0x1f0] sm:$0xff] }
  0x2b   :  { %348 = vst [vmem:[%s1049_s3 + $0x110] sm:$0xff] %v275_v38  ;;  %v289_v38 = vmax.f32 %v813_v15, 0.0  ;;  %v221_v40 = vadd.f32 %v424_v2, %v144_v17  ;;  %v872_v41 = vadd.f32 %v424_v2, %v154_v28  ;;  %v222_v44 = vadd.f32 %v424_v2, %v145_v22 }
  0x2c   :  { %349 = vst [vmem:[%s1049_s3 + $0x118] sm:$0xff] %v276_v42  ;;  %v83_v42 = vld [vmem:[%s1046_s0 + $0x228] sm:$0xff]  ;;  %v147_v45 = vmul.f32 %v419_v1, %v70_v23  ;;  %v155_v46 = vmul.f32 %v419_v1, %v78_v29  ;;  %v156_v47 = vmul.f32 %v419_v1, %v79_v30  ;;  %v148_v49 = vmul.f32 %v419_v1, %v71_v24 }
  0x2d   :  { %350 = vst [vmem:[%s1049_s3 + $0x120] sm:$0xff] %v277_v52  ;;  %v157_v51 = vmul.f32 %v419_v1, %v80_v35  ;;  %v158_v52 = vmul.f32 %v419_v1, %v81_v36  ;;  %v159_v53 = vmul.f32 %v419_v1, %v82_v37  ;;  %v160_v57 = vmul.f32 %v419_v1, %v83_v42 }
  0x2e   :  { %351 = vst [vmem:[%s1049_s3 + $0x128] sm:$0xff] %v278_v54  ;;  %v73_v54 = vld [vmem:[%s1046_s0 + $0x1d8] sm:$0xff]  ;;  %v907_v55 = vadd.f32 %v424_v2, %v155_v46  ;;  %v910_v56 = vadd.f32 %v424_v2, %v156_v47  ;;  %v161_v58 = vmul.f32 %v419_v1, %v84_v43  ;;  %v162_v63 = vmul.f32 %v419_v1, %v85_v48 }
  0x2f   :  { %352 = vst [vmem:[%s1049_s3 + $0x130] sm:$0xff] %v279_v61  ;;  %v921_v60 = vadd.f32 %v424_v2, %v157_v51  ;;  %v924_v61 = vadd.f32 %v424_v2, %v158_v52  ;;  %v927_v62 = vadd.f32 %v424_v2, %v159_v53  ;;  %v291_v3 = vmax.f32 %v218_v31, 0.0 }
  0x30   :  { %353 = vst [vmem:[%s1049_s3 + $0x138] sm:$0xff] %v280_v4  ;;  %v149_v4 = vmul.f32 %v419_v1, %v72_v50  ;;  %v237_v6 = vadd.f32 %v424_v2, %v160_v57  ;;  %v238_v7 = vadd.f32 %v424_v2, %v161_v58  ;;  %v292_v8 = vmax.f32 %v850_v32, 0.0 }
  0x31   :  { %354 = vst [vmem:[%s1049_s3 + $0x140] sm:$0xff] %v281_v9  ;;  %v223_v9 = vadd.f32 %v424_v2, %v146_v34  ;;  %v150_v10 = vmul.f32 %v419_v1, %v73_v54  ;;  %v239_v12 = vadd.f32 %v424_v2, %v162_v63  ;;  %v293_v13 = vmax.f32 %v853_v33, 0.0 }
  0x32   :  { %355 = vst [vmem:[%s1049_s3 + $0x148] sm:$0xff] %v282_v14  ;;  %v224_v14 = vadd.f32 %v424_v2, %v147_v45  ;;  %v151_v15 = vmul.f32 %v419_v1, %v74_v59  ;;  %v163_v16 = vmul.f32 %v419_v1, %v86_v0  ;;  %v294_v17 = vmax.f32 %v221_v40, 0.0 }
  0x33   :  { %356 = vst [vmem:[%s1049_s3 + $0x150] sm:$0xff] %v283_v19  ;;  %v225_v18 = vadd.f32 %v424_v2, %v148_v49  ;;  %v152_v19 = vmul.f32 %v419_v1, %v75_v5  ;;  %v153_v22 = vmul.f32 %v419_v1, %v76_v11  ;;  %v296_v24 = vmax.f32 %v223_v9, 0.0 }
  0x34   :  { %357 = vst [vmem:[%s1049_s3 + $0x158] sm:$0xff] %v284_v20  ;;  %v295_v20 = vmax.f32 %v222_v44, 0.0  ;;  %v240_v23 = vadd.f32 %v424_v2, %v163_v16  ;;  %v304_v34 = vmax.f32 %v872_v41, 0.0  ;;  %v305_v35 = vmax.f32 %v907_v55, 0.0 }
  0x35   :  { %358 = vst [vmem:[%s1049_s3 + $0x160] sm:$0xff] %v285_v21  ;;  %v226_v21 = vadd.f32 %v424_v2, %v149_v4  ;;  %v298_v1 = vmax.f32 %v225_v18, 0.0  ;;  %v229_v28 = vadd.f32 %v424_v2, %v152_v19  ;;  %v230_v30 = vadd.f32 %v424_v2, %v153_v22 }
  0x36   :  { %359 = vst [vmem:[%s1049_s3 + $0x168] sm:$0xff] %v286_v25  ;;  %v227_v25 = vadd.f32 %v424_v2, %v150_v10  ;;  %v306_v36 = vmax.f32 %v910_v56, 0.0  ;;  %v307_v37 = vmax.f32 %v921_v60, 0.0  ;;  %v310_v40 = vmax.f32 %v237_v6, 0.0 }
  0x37   :  { %360 = vst [vmem:[%s1049_s3 + $0x170] sm:$0xff] %v287_v26  ;;  %v297_v26 = vmax.f32 %v224_v14, 0.0  ;;  %v299_v29 = vmax.f32 %v226_v21, 0.0  ;;  %v302_v33 = vmax.f32 %v229_v28, 0.0  ;;  %v311_v41 = vmax.f32 %v238_v7, 0.0 }
  0x38   :  { %361 = vst [vmem:[%s1049_s3 + $0x178] sm:$0xff] %v288_v27  ;;  %v228_v27 = vadd.f32 %v424_v2, %v151_v15  ;;  %v300_v31 = vmax.f32 %v227_v25, 0.0  ;;  %v303_v2 = vmax.f32 %v230_v30, 0.0  ;;  %v312_v42 = vmax.f32 %v239_v12, 0.0 }
  0x39   :  { %362 = vst [vmem:[%s1049_s3 + $0x180] sm:$0xff] %v289_v38  ;;  %v308_v38 = vmax.f32 %v924_v61, 0.0  ;;  %v313_v43 = vmax.f32 %v240_v23, 0.0 }
  0x3a   :  { %363 = vst [vmem:[%s1049_s3 + $0x188] sm:$0xff] %v290_v39  ;;  %v301_v32 = vmax.f32 %v228_v27, 0.0  ;;  %v309_v39 = vmax.f32 %v927_v62, 0.0 }
  0x3b   :  { %364 = vst [vmem:[%s1049_s3 + $0x190] sm:$0xff] %v291_v3 }
  0x3c   :  { %365 = vst [vmem:[%s1049_s3 + $0x198] sm:$0xff] %v292_v8 }
  0x3d   :  { %366 = vst [vmem:[%s1049_s3 + $0x1a0] sm:$0xff] %v293_v13 }
  0x3e   :  { %367 = vst [vmem:[%s1049_s3 + $0x1a8] sm:$0xff] %v294_v17 }
  0x3f   :  { %368 = vst [vmem:[%s1049_s3 + $0x1b0] sm:$0xff] %v295_v20 }
  0x40   :  { %369 = vst [vmem:[%s1049_s3 + $0x1b8] sm:$0xff] %v296_v24 }
  0x41   :  { %370 = vst [vmem:[%s1049_s3 + $0x1c0] sm:$0xff] %v297_v26 }
  0x42   :  { %371 = vst [vmem:[%s1049_s3 + $0x1c8] sm:$0xff] %v298_v1 }
  0x43   :  { %372 = vst [vmem:[%s1049_s3 + $0x1d0] sm:$0xff] %v299_v29 }
  0x44   :  { %373 = vst [vmem:[%s1049_s3 + $0x1d8] sm:$0xff] %v300_v31 }
  0x45   :  { %374 = vst [vmem:[%s1049_s3 + $0x1e0] sm:$0xff] %v301_v32 }
  0x46   :  { %375 = vst [vmem:[%s1049_s3 + $0x1e8] sm:$0xff] %v302_v33 }
  0x47   :  { %376 = vst [vmem:[%s1049_s3 + $0x1f0] sm:$0xff] %v303_v2 }
  0x48   :  { %377 = vst [vmem:[%s1049_s3 + $0x1f8] sm:$0xff] %v304_v34 }
  0x49   :  { %378 = vst [vmem:[%s1049_s3 + $0x200] sm:$0xff] %v305_v35 }
  0x4a   :  { %379 = vst [vmem:[%s1049_s3 + $0x208] sm:$0xff] %v306_v36 }
  0x4b   :  { %380 = vst [vmem:[%s1049_s3 + $0x210] sm:$0xff] %v307_v37 }
  0x4c   :  { %381 = vst [vmem:[%s1049_s3 + $0x218] sm:$0xff] %v308_v38 }
  0x4d   :  { %382 = vst [vmem:[%s1049_s3 + $0x220] sm:$0xff] %v309_v39 }
  0x4e   :  { %383 = vst [vmem:[%s1049_s3 + $0x228] sm:$0xff] %v310_v40 }
  0x4f   :  { %384 = vst [vmem:[%s1049_s3 + $0x230] sm:$0xff] %v311_v41 }
  0x50   :  { %385 = vst [vmem:[%s1049_s3 + $0x238] sm:$0xff] %v312_v42 }
  0x51   :  { %386 = vst [vmem:[%s1049_s3 + $0x240] sm:$0xff] %v313_v43 }

// kernel: basic_deconv_bn_relu.2
= control target key start
LH: loop header
LB: loop body
LE: loop exit
PB: predicated region body
PF: predicated region fallthrough
CT: control target
= control target key end

     0   :  { %vm279_vm0 = vcmask 130048   ;;  %s1850_s1 = inlined_call_operand.vmem [shape: bf16[16,128], index: 1, kind: input, shape index: {}]   ;;  %s1851_s0 = inlined_call_operand.vmem [shape: bf16[584,16], index: 0, kind: input, shape index: {}]   ;;  %s1852_s2 = inlined_call_operand.vmem [shape: f32[584,128], index: 2, kind: output, shape index: {0}]   ;;  %s1853_s3 = inlined_call_operand.vmem [shape: f32[1,1,128], index: 3, kind: output, shape index: {1}]   ;;  %s1854_s4 = inlined_call_operand.vmem [shape: f32[1,1,128], index: 4, kind: output, shape index: {2}]  }
   0x1   :  { %v1121_v0 = vld [vmem:[%s1850_s1] sm:$0xff]  ;;  %v1095_v2 = vld [vmem:[%s1851_s0 + $0x50] sm:$0xff]  ;;  %v1086_v3 = vld [vmem:[%s1851_s0 + $0x8] sm:$0xff] }
   0x2   :  { %v1085_v1 = vld [vmem:[%s1851_s0] sm:$0xff]  ;;  %398 = vmatpush.bf16.msra.mxu0 %v1121_v0  ;;  %1122 = vmatpush.bf16.msra.mxu1 %v1121_v0  ;;  %v1096_v4 = vld [vmem:[%s1851_s0 + $0x58] sm:$0xff]  ;;  %v1087_v5 = vld [vmem:[%s1851_s0 + $0x10] sm:$0xff] }
   0x3   :  { %1123 = vmatpush.bf16.msra.mxu2 %v1121_v0  ;;  %1124 = vmatpush.bf16.msra.mxu3 %v1121_v0  ;;  %v1097_v6 = vld [vmem:[%s1851_s0 + $0x60] sm:$0xff]  ;;  %v1088_v8 = vld [vmem:[%s1851_s0 + $0x18] sm:$0xff]  ;;  %v1098_v9 = vld [vmem:[%s1851_s0 + $0x68] sm:$0xff] }
   0x4   :  { %v1105_v7 = vld [vmem:[%s1851_s0 + $0xa0] sm:$0xff]  ;;  %v1106_v10 = vld [vmem:[%s1851_s0 + $0xa8] sm:$0xff]  ;;  %v1099_v12 = vld [vmem:[%s1851_s0 + $0x70] sm:$0xff] }
   0x5   :  { %1048 = vmatmul.msk.bf16.vlgmr.msra.gmra.mxu0 %vm279_vm0, %v1085_v1  ;;  %1058 = vmatmul.msk.bf16.vlgmr.msra.gmra.mxu1 %vm279_vm0, %v1095_v2  ;;  %v1089_v11 = vld [vmem:[%s1851_s0 + $0x20] sm:$0xff]  ;;  %v1107_v13 = vld [vmem:[%s1851_s0 + $0xb0] sm:$0xff]  ;;  %v1090_v14 = vld [vmem:[%s1851_s0 + $0x28] sm:$0xff] }
   0x6   :  { %1068 = vmatmul.msk.bf16.vlgmr.msra.gmra.mxu2 %vm279_vm0, %v1105_v7  ;;  %v1100_v15 = vld [vmem:[%s1851_s0 + $0x78] sm:$0xff]  ;;  %v1091_v17 = vld [vmem:[%s1851_s0 + $0x30] sm:$0xff]  ;;  %v1101_v18 = vld [vmem:[%s1851_s0 + $0x80] sm:$0xff] }
   0x7   :  { %v1108_v16 = vld [vmem:[%s1851_s0 + $0xb8] sm:$0xff]  ;;  %v1109_v19 = vld [vmem:[%s1851_s0 + $0xc0] sm:$0xff]  ;;  %v1102_v21 = vld [vmem:[%s1851_s0 + $0x88] sm:$0xff] }
   0x8   :  { %v1092_v20 = vld [vmem:[%s1851_s0 + $0x38] sm:$0xff]  ;;  %v1110_v22 = vld [vmem:[%s1851_s0 + $0xc8] sm:$0xff]  ;;  %v1115_v23 = vld [vmem:[%s1851_s0 + $0xf0] sm:$0xff] }
   0x9   :  { %1078 = vmatmul.msk.bf16.vlgmr.msra.gmra.mxu3 %vm279_vm0, %v1115_v23  ;;  %v1093_v24 = vld [vmem:[%s1851_s0 + $0x40] sm:$0xff]  ;;  %v1103_v27 = vld [vmem:[%s1851_s0 + $0x90] sm:$0xff]  ;;  %v1116_v29 = vld [vmem:[%s1851_s0 + $0xf8] sm:$0xff] }
   0xa   :  { %v1111_v28 = vld [vmem:[%s1851_s0 + $0xd0] sm:$0xff]  ;;  %v1094_v36 = vld [vmem:[%s1851_s0 + $0x48] sm:$0xff]  ;;  %v1104_v41 = vld [vmem:[%s1851_s0 + $0x98] sm:$0xff] }
   0xb   :  { %v1112_v43 = vld [vmem:[%s1851_s0 + $0xd8] sm:$0xff]  ;;  %v1117_v44 = vld [vmem:[%s1851_s0 + $0x100] sm:$0xff]  ;;  %v1118_v56 = vld [vmem:[%s1851_s0 + $0x108] sm:$0xff] }
   0xc   :  { %v1113_v55 = vld [vmem:[%s1851_s0 + $0xe0] sm:$0xff] }
  0x15   :  { %1049 = vmatmul.msk.bf16.gmra.mxu0 %vm279_vm0, %v1086_v3  ;;  %1059 = vmatmul.msk.bf16.gmra.mxu1 %vm279_vm0, %v1096_v4 }
  0x16   :  { %1069 = vmatmul.msk.bf16.gmra.mxu2 %vm279_vm0, %v1106_v10 }
  0x19   :  { %1079 = vmatmul.msk.bf16.gmra.mxu3 %vm279_vm0, %v1116_v29 }
  0x25   :  { %1050 = vmatmul.msk.bf16.gmra.mxu0 %vm279_vm0, %v1087_v5  ;;  %1060 = vmatmul.msk.bf16.gmra.mxu1 %vm279_vm0, %v1097_v6  ;;  %v1114_v5 = vld [vmem:[%s1851_s0 + $0xe8] sm:$0xff]  ;;  %v1119_v6 = vld [vmem:[%s1851_s0 + $0x110] sm:$0xff] }
  0x26   :  { %1070 = vmatmul.msk.bf16.gmra.mxu2 %vm279_vm0, %v1107_v13 }
  0x29   :  { %1080 = vmatmul.msk.bf16.gmra.mxu3 %vm279_vm0, %v1117_v44 }
  0x35   :  { %1051 = vmatmul.msk.bf16.gmra.mxu0 %vm279_vm0, %v1088_v8  ;;  %1061 = vmatmul.msk.bf16.gmra.mxu1 %vm279_vm0, %v1098_v9 }
  0x36   :  { %1071 = vmatmul.msk.bf16.gmra.mxu2 %vm279_vm0, %v1108_v16 }
  0x39   :  { %1081 = vmatmul.msk.bf16.gmra.mxu3 %vm279_vm0, %v1118_v56 }
  0x45   :  { %1052 = vmatmul.msk.bf16.gmra.mxu0 %vm279_vm0, %v1089_v11  ;;  %1062 = vmatmul.msk.bf16.gmra.mxu1 %vm279_vm0, %v1099_v12 }
  0x46   :  { %1072 = vmatmul.msk.bf16.gmra.mxu2 %vm279_vm0, %v1109_v19  ;;  %v1120_v19 = vld [vmem:[%s1851_s0 + $0x118] sm:$0xff] }
  0x49   :  { %1082 = vmatmul.msk.bf16.gmra.mxu3 %vm279_vm0, %v1119_v6 }
  0x55   :  { %1053 = vmatmul.msk.bf16.gmra.mxu0 %vm279_vm0, %v1090_v14  ;;  %1063 = vmatmul.msk.bf16.gmra.mxu1 %vm279_vm0, %v1100_v15 }
  0x56   :  { %1073 = vmatmul.msk.bf16.gmra.mxu2 %vm279_vm0, %v1110_v22 }
  0x59   :  { %1083 = vmatmul.msk.bf16.gmra.mxu3 %vm279_vm0, %v1120_v19 }
  0x65   :  { %1054 = vmatmul.msk.bf16.gmra.mxu0 %vm279_vm0, %v1091_v17  ;;  %1064 = vmatmul.msk.bf16.gmra.mxu1 %vm279_vm0, %v1101_v18 }
  0x66   :  { %1074 = vmatmul.msk.bf16.gmra.mxu2 %vm279_vm0, %v1111_v28 }
  0x75   :  { %1055 = vmatmul.msk.bf16.gmra.mxu0 %vm279_vm0, %v1092_v20  ;;  %1065 = vmatmul.msk.bf16.gmra.mxu1 %vm279_vm0, %v1102_v21 }
  0x76   :  { %1075 = vmatmul.msk.bf16.gmra.mxu2 %vm279_vm0, %v1112_v43 }
  0x82   :  { %v400_v25 = vpop.f32.mrf.mxu0  ;;  %v1248_v26 = vpop.f32.mrf.mxu1 }
  0x83   :  { %584 = vst [vmem:[%s1852_s2] sm:$0xff] %v400_v25  ;;  %v736_v32 = vmul.f32 %v400_v25, %v400_v25 }
  0x84   :  { %604 = vst [vmem:[%s1852_s2 + $0xa0] sm:$0xff] %v1248_v26 }
  0x85   :  { %1056 = vmatmul.msk.bf16.gmra.mxu0 %vm279_vm0, %v1093_v24  ;;  %1066 = vmatmul.msk.bf16.gmra.mxu1 %vm279_vm0, %v1103_v27  ;;  %v87_v27 = vld [vmem:[%s1851_s0 + $0x120] sm:$0xf] }
  0x86   :  { %1076 = vmatmul.msk.bf16.gmra.mxu2 %vm279_vm0, %v1113_v55  ;;  %v235_v28 = vunpack.c.l.b16 %v87_v27 }
  0x88   :  { %v272_v29 = vpack.c.b16 %v235_v28, %v235_v28 }
  0x89   :  { %v1335_v61 = vpop.f32.mrf.mxu2 }
  0x8a   :  { %v402_v30 = vpop.f32.mrf.mxu0  ;;  %v1270_v31 = vpop.f32.mrf.mxu1  ;;  %624 = vst [vmem:[%s1852_s2 + $0x140] sm:$0xff] %v1335_v61  ;;  %1084 = vmatmul.msk.bf16.gmra.mxu3 %vm279_vm0, %v272_v29 }
  0x8b   :  { %585 = vst [vmem:[%s1852_s2 + $0x8] sm:$0xff] %v402_v30  ;;  %v657_v33 = vadd.f32 %v402_v30, %v400_v25  ;;  %v737_v34 = vmul.f32 %v402_v30, %v402_v30 }
  0x8c   :  { %605 = vst [vmem:[%s1852_s2 + $0xa8] sm:$0xff] %v1270_v31 }
  0x8d   :  { %v809_v35 = vadd.f32 %v737_v34, %v736_v32 }
  0x91   :  { %v1350_v3 = vpop.f32.mrf.mxu2 }
  0x92   :  { %v405_v37 = vpop.f32.mrf.mxu0  ;;  %v1282_v38 = vpop.f32.mrf.mxu1  ;;  %625 = vst [vmem:[%s1852_s2 + $0x148] sm:$0xff] %v1350_v3 }
  0x93   :  { %586 = vst [vmem:[%s1852_s2 + $0x10] sm:$0xff] %v405_v37  ;;  %v658_v39 = vadd.f32 %v657_v33, %v405_v37  ;;  %v738_v40 = vmul.f32 %v405_v37, %v405_v37 }
  0x94   :  { %606 = vst [vmem:[%s1852_s2 + $0xb0] sm:$0xff] %v1282_v38 }
  0x95   :  { %v810_v42 = vadd.f32 %v809_v35, %v738_v40  ;;  %1057 = vmatmul.msk.bf16.gmra.mxu0 %vm279_vm0, %v1094_v36  ;;  %1067 = vmatmul.msk.bf16.gmra.mxu1 %vm279_vm0, %v1104_v41 }
  0x96   :  { %1077 = vmatmul.msk.bf16.gmra.mxu2 %vm279_vm0, %v1114_v5 }
  0x99   :  { %v1373_v11 = vpop.f32.mrf.mxu2 }
  0x9a   :  { %v407_v45 = vpop.f32.mrf.mxu0  ;;  %v1304_v46 = vpop.f32.mrf.mxu1  ;;  %626 = vst [vmem:[%s1852_s2 + $0x150] sm:$0xff] %v1373_v11 }
  0x9b   :  { %587 = vst [vmem:[%s1852_s2 + $0x18] sm:$0xff] %v407_v45  ;;  %v659_v47 = vadd.f32 %v658_v39, %v407_v45  ;;  %v739_v48 = vmul.f32 %v407_v45, %v407_v45 }
  0x9c   :  { %607 = vst [vmem:[%s1852_s2 + $0xb8] sm:$0xff] %v1304_v46 }
  0x9d   :  { %v811_v49 = vadd.f32 %v810_v42, %v739_v48  ;;  %v1511_v48 = vpop.f32.mrf.mxu3 }
  0x9e   :  { %644 = vst [vmem:[%s1852_s2 + $0x1e0] sm:$0xff] %v1511_v48 }
  0xa1   :  { %v1390_v17 = vpop.f32.mrf.mxu2 }
  0xa2   :  { %v410_v50 = vpop.f32.mrf.mxu0  ;;  %v1313_v51 = vpop.f32.mrf.mxu1  ;;  %627 = vst [vmem:[%s1852_s2 + $0x158] sm:$0xff] %v1390_v17 }
  0xa3   :  { %588 = vst [vmem:[%s1852_s2 + $0x20] sm:$0xff] %v410_v50  ;;  %v660_v52 = vadd.f32 %v659_v47, %v410_v50  ;;  %v740_v53 = vmul.f32 %v410_v50, %v410_v50 }
  0xa4   :  { %608 = vst [vmem:[%s1852_s2 + $0xc0] sm:$0xff] %v1313_v51 }
  0xa5   :  { %v812_v54 = vadd.f32 %v811_v49, %v740_v53  ;;  %v1532_v53 = vpop.f32.mrf.mxu3 }
  0xa6   :  { %645 = vst [vmem:[%s1852_s2 + $0x1e8] sm:$0xff] %v1532_v53 }
  0xa9   :  { %v1411_v22 = vpop.f32.mrf.mxu2 }
  0xaa   :  { %v412_v57 = vpop.f32.mrf.mxu0  ;;  %v1330_v58 = vpop.f32.mrf.mxu1  ;;  %628 = vst [vmem:[%s1852_s2 + $0x160] sm:$0xff] %v1411_v22 }
  0xab   :  { %589 = vst [vmem:[%s1852_s2 + $0x28] sm:$0xff] %v412_v57  ;;  %v661_v59 = vadd.f32 %v660_v52, %v412_v57  ;;  %v741_v60 = vmul.f32 %v412_v57, %v412_v57 }
  0xac   :  { %609 = vst [vmem:[%s1852_s2 + $0xc8] sm:$0xff] %v1330_v58 }
  0xad   :  { %v813_v62 = vadd.f32 %v812_v54, %v741_v60  ;;  %v1555_v6 = vpop.f32.mrf.mxu3 }
  0xae   :  { %646 = vst [vmem:[%s1852_s2 + $0x1f0] sm:$0xff] %v1555_v6 }
  0xb1   :  { %v1426_v25 = vpop.f32.mrf.mxu2 }
  0xb2   :  { %v415_v63 = vpop.f32.mrf.mxu0  ;;  %v1345_v0 = vpop.f32.mrf.mxu1  ;;  %629 = vst [vmem:[%s1852_s2 + $0x168] sm:$0xff] %v1426_v25 }
  0xb3   :  { %590 = vst [vmem:[%s1852_s2 + $0x30] sm:$0xff] %v415_v63  ;;  %v662_v1 = vadd.f32 %v661_v59, %v415_v63  ;;  %v742_v2 = vmul.f32 %v415_v63, %v415_v63 }
  0xb4   :  { %610 = vst [vmem:[%s1852_s2 + $0xd0] sm:$0xff] %v1345_v0 }
  0xb5   :  { %v814_v4 = vadd.f32 %v813_v62, %v742_v2 }
  0xb9   :  { %v1445_v33 = vpop.f32.mrf.mxu2 }
  0xba   :  { %v417_v7 = vpop.f32.mrf.mxu0  ;;  %v1368_v8 = vpop.f32.mrf.mxu1  ;;  %630 = vst [vmem:[%s1852_s2 + $0x170] sm:$0xff] %v1445_v33 }
  0xbb   :  { %591 = vst [vmem:[%s1852_s2 + $0x38] sm:$0xff] %v417_v7  ;;  %v663_v9 = vadd.f32 %v662_v1, %v417_v7  ;;  %v743_v10 = vmul.f32 %v417_v7, %v417_v7 }
  0xbc   :  { %611 = vst [vmem:[%s1852_s2 + $0xd8] sm:$0xff] %v1368_v8 }
  0xbd   :  { %v815_v12 = vadd.f32 %v814_v4, %v743_v10 }
  0xc1   :  { %v1460_v36 = vpop.f32.mrf.mxu2 }
  0xc2   :  { %v420_v13 = vpop.f32.mrf.mxu0  ;;  %v1383_v14 = vpop.f32.mrf.mxu1  ;;  %631 = vst [vmem:[%s1852_s2 + $0x178] sm:$0xff] %v1460_v36 }
  0xc3   :  { %592 = vst [vmem:[%s1852_s2 + $0x40] sm:$0xff] %v420_v13  ;;  %v1388_v15 = vadd.f32 %v663_v9, %v420_v13  ;;  %v744_v16 = vmul.f32 %v420_v13, %v420_v13 }
  0xc4   :  { %612 = vst [vmem:[%s1852_s2 + $0xe0] sm:$0xff] %v1383_v14 }
  0xc5   :  { %v1396_v18 = vadd.f32 %v815_v12, %v744_v16 }
  0xc9   :  { %v1475_v40 = vpop.f32.mrf.mxu2 }
  0xca   :  { %v422_v20 = vpop.f32.mrf.mxu0  ;;  %v1406_v21 = vpop.f32.mrf.mxu1  ;;  %632 = vst [vmem:[%s1852_s2 + $0x180] sm:$0xff] %v1475_v40 }
  0xcb   :  { %593 = vst [vmem:[%s1852_s2 + $0x48] sm:$0xff] %v422_v20  ;;  %v745_v54 = vmul.f32 %v422_v20, %v422_v20  ;;  %v665_v55 = vadd.f32 %v1388_v15, %v422_v20 }
  0xcc   :  { %613 = vst [vmem:[%s1852_s2 + $0xe8] sm:$0xff] %v1406_v21 }
  0xcd   :  { %v817_v57 = vadd.f32 %v1396_v18, %v745_v54 }
  0xd1   :  { %v1490_v43 = vpop.f32.mrf.mxu2 }
  0xd2   :  { %v425_v23 = vpop.f32.mrf.mxu0  ;;  %v1421_v24 = vpop.f32.mrf.mxu1  ;;  %633 = vst [vmem:[%s1852_s2 + $0x188] sm:$0xff] %v1490_v43 }
  0xd3   :  { %594 = vst [vmem:[%s1852_s2 + $0x50] sm:$0xff] %v425_v23  ;;  %v746_v56 = vmul.f32 %v425_v23, %v425_v23  ;;  %v666_v59 = vadd.f32 %v665_v55, %v425_v23 }
  0xd4   :  { %614 = vst [vmem:[%s1852_s2 + $0xf0] sm:$0xff] %v1421_v24 }
  0xd5   :  { %v818_v1 = vadd.f32 %v817_v57, %v746_v56 }
  0xd9   :  { %v1505_v47 = vpop.f32.mrf.mxu2 }
  0xda   :  { %v427_v30 = vpop.f32.mrf.mxu0  ;;  %v1440_v32 = vpop.f32.mrf.mxu1  ;;  %634 = vst [vmem:[%s1852_s2 + $0x190] sm:$0xff] %v1505_v47 }
  0xdb   :  { %595 = vst [vmem:[%s1852_s2 + $0x58] sm:$0xff] %v427_v30  ;;  %v747_v60 = vmul.f32 %v427_v30, %v427_v30  ;;  %v667_v2 = vadd.f32 %v666_v59, %v427_v30 }
  0xdc   :  { %615 = vst [vmem:[%s1852_s2 + $0xf8] sm:$0xff] %v1440_v32 }
  0xdd   :  { %v819_v7 = vadd.f32 %v818_v1, %v747_v60 }
  0xe1   :  { %v1526_v52 = vpop.f32.mrf.mxu2 }
  0xe2   :  { %v430_v34 = vpop.f32.mrf.mxu0  ;;  %v1455_v35 = vpop.f32.mrf.mxu1  ;;  %635 = vst [vmem:[%s1852_s2 + $0x198] sm:$0xff] %v1526_v52 }
  0xe3   :  { %596 = vst [vmem:[%s1852_s2 + $0x60] sm:$0xff] %v430_v34  ;;  %v748_v4 = vmul.f32 %v430_v34, %v430_v34  ;;  %v668_v9 = vadd.f32 %v667_v2, %v430_v34  ;;  %v1576_v34 = vpop.f32.mrf.mxu3 }
  0xe4   :  { %616 = vst [vmem:[%s1852_s2 + $0x100] sm:$0xff] %v1455_v35 }
  0xe5   :  { %v820_v12 = vadd.f32 %v819_v7, %v748_v4  ;;  %647 = vst [vmem:[%s1852_s2 + $0x1f8] sm:$0xff] %v1576_v34 }
  0xe9   :  { %v1549_v5 = vpop.f32.mrf.mxu2 }
  0xea   :  { %v432_v37 = vpop.f32.mrf.mxu0  ;;  %v1470_v39 = vpop.f32.mrf.mxu1  ;;  %636 = vst [vmem:[%s1852_s2 + $0x1a0] sm:$0xff] %v1549_v5 }
  0xeb   :  { %597 = vst [vmem:[%s1852_s2 + $0x68] sm:$0xff] %v432_v37  ;;  %v749_v10 = vmul.f32 %v432_v37, %v432_v37  ;;  %v669_v13 = vadd.f32 %v668_v9, %v432_v37  ;;  %v756_v9 = vmul.f32 %v1248_v26, %v1248_v26 }
  0xec   :  { %617 = vst [vmem:[%s1852_s2 + $0x108] sm:$0xff] %v1470_v39 }
  0xed   :  { %v821_v16 = vadd.f32 %v820_v12, %v749_v10 }
  0xf1   :  { %v1570_v30 = vpop.f32.mrf.mxu2 }
  0xf2   :  { %v435_v41 = vpop.f32.mrf.mxu0  ;;  %v1485_v42 = vpop.f32.mrf.mxu1  ;;  %637 = vst [vmem:[%s1852_s2 + $0x1a8] sm:$0xff] %v1570_v30 }
  0xf3   :  { %598 = vst [vmem:[%s1852_s2 + $0x70] sm:$0xff] %v435_v41  ;;  %v750_v15 = vmul.f32 %v435_v41, %v435_v41  ;;  %v670_v18 = vadd.f32 %v669_v13, %v435_v41  ;;  %v757_v13 = vmul.f32 %v1270_v31, %v1270_v31 }
  0xf4   :  { %618 = vst [vmem:[%s1852_s2 + $0x110] sm:$0xff] %v1485_v42 }
  0xf5   :  { %v822_v27 = vadd.f32 %v821_v16, %v750_v15 }
  0xf9   :  { %v1591_v7 = vpop.f32.mrf.mxu2 }
  0xfa   :  { %v437_v44 = vpop.f32.mrf.mxu0  ;;  %v1500_v45 = vpop.f32.mrf.mxu1  ;;  %638 = vst [vmem:[%s1852_s2 + $0x1b0] sm:$0xff] %v1591_v7 }
  0xfb   :  { %599 = vst [vmem:[%s1852_s2 + $0x78] sm:$0xff] %v437_v44  ;;  %v751_v19 = vmul.f32 %v437_v44, %v437_v44  ;;  %v671_v28 = vadd.f32 %v670_v18, %v437_v44 }
  0xfc   :  { %619 = vst [vmem:[%s1852_s2 + $0x118] sm:$0xff] %v1500_v45 }
  0xfd   :  { %v823_v37 = vadd.f32 %v822_v27, %v751_v19 }
 0x102   :  { %v440_v49 = vpop.f32.mrf.mxu0  ;;  %v1521_v50 = vpop.f32.mrf.mxu1 }
 0x103   :  { %600 = vst [vmem:[%s1852_s2 + $0x80] sm:$0xff] %v440_v49  ;;  %v752_v29 = vmul.f32 %v440_v49, %v440_v49  ;;  %v672_v41 = vadd.f32 %v671_v28, %v440_v49 }
 0x104   :  { %620 = vst [vmem:[%s1852_s2 + $0x120] sm:$0xff] %v1521_v50 }
 0x105   :  { %v824_v44 = vadd.f32 %v823_v37, %v752_v29  ;;  %v1619_v29 = vpop.f32.mrf.mxu2  ;;  %v760_v37 = vmul.f32 %v1313_v51, %v1313_v51 }
 0x106   :  { %639 = vst [vmem:[%s1852_s2 + $0x1b8] sm:$0xff] %v1619_v29 }
 0x10a   :  { %v442_v62 = vpop.f32.mrf.mxu0  ;;  %v1544_v63 = vpop.f32.mrf.mxu1 }
 0x10b   :  { %601 = vst [vmem:[%s1852_s2 + $0x88] sm:$0xff] %v442_v62  ;;  %v753_v54 = vmul.f32 %v442_v62, %v442_v62  ;;  %v673_v55 = vadd.f32 %v672_v41, %v442_v62  ;;  %v1597_v62 = vpop.f32.mrf.mxu3 }
 0x10c   :  { %621 = vst [vmem:[%s1852_s2 + $0x128] sm:$0xff] %v1544_v63 }
 0x10d   :  { %v825_v57 = vadd.f32 %v824_v44, %v753_v54  ;;  %648 = vst [vmem:[%s1852_s2 + $0x200] sm:$0xff] %v1597_v62 }
 0x112   :  { %v445_v20 = vpop.f32.mrf.mxu0  ;;  %v1565_v23 = vpop.f32.mrf.mxu1 }
 0x113   :  { %602 = vst [vmem:[%s1852_s2 + $0x90] sm:$0xff] %v445_v20  ;;  %v754_v56 = vmul.f32 %v445_v20, %v445_v20  ;;  %v674_v59 = vadd.f32 %v673_v55, %v445_v20  ;;  %v759_v20 = vmul.f32 %v1304_v46, %v1304_v46  ;;  %v762_v55 = vmul.f32 %v1345_v0, %v1345_v0 }
 0x114   :  { %622 = vst [vmem:[%s1852_s2 + $0x130] sm:$0xff] %v1565_v23 }
 0x115   :  { %v826_v49 = vadd.f32 %v825_v57, %v754_v56 }
 0x11a   :  { %v447_v60 = vpop.f32.mrf.mxu0  ;;  %v1586_v1 = vpop.f32.mrf.mxu1 }
 0x11b   :  { %603 = vst [vmem:[%s1852_s2 + $0x98] sm:$0xff] %v447_v60  ;;  %v675_v2 = vadd.f32 %v674_v59, %v447_v60  ;;  %v755_v4 = vmul.f32 %v447_v60, %v447_v60 }
 0x11c   :  { %623 = vst [vmem:[%s1852_s2 + $0x138] sm:$0xff] %v1586_v1 }
 0x11d   :  { %v676_v10 = vadd.f32 %v675_v2, %v1248_v26  ;;  %v827_v12 = vadd.f32 %v826_v49, %v755_v4  ;;  %v758_v26 = vmul.f32 %v1282_v38, %v1282_v38  ;;  %v1643_v49 = vpop.f32.mrf.mxu2  ;;  %v764_v2 = vmul.f32 %v1383_v14, %v1383_v14 }
 0x11e   :  { %640 = vst [vmem:[%s1852_s2 + $0x1c0] sm:$0xff] %v1643_v49 }
 0x11f   :  { %v677_v15 = vadd.f32 %v676_v10, %v1270_v31  ;;  %v828_v16 = vadd.f32 %v827_v12, %v756_v9  ;;  %v1625_v31 = vpop.f32.mrf.mxu3  ;;  %v766_v12 = vmul.f32 %v1421_v24, %v1421_v24 }
 0x120   :  { %649 = vst [vmem:[%s1852_s2 + $0x208] sm:$0xff] %v1625_v31 }
 0x121   :  { %v678_v18 = vadd.f32 %v677_v15, %v1282_v38  ;;  %v829_v19 = vadd.f32 %v828_v16, %v757_v13 }
 0x123   :  { %v679_v27 = vadd.f32 %v678_v18, %v1304_v46  ;;  %v830_v28 = vadd.f32 %v829_v19, %v758_v26  ;;  %v761_v46 = vmul.f32 %v1330_v58, %v1330_v58  ;;  %v768_v19 = vmul.f32 %v1455_v35, %v1455_v35 }
 0x125   :  { %v680_v38 = vadd.f32 %v679_v27, %v1313_v51  ;;  %v831_v41 = vadd.f32 %v830_v28, %v759_v20  ;;  %v763_v51 = vmul.f32 %v1368_v8, %v1368_v8  ;;  %v1667_v18 = vpop.f32.mrf.mxu2 }
 0x126   :  { %641 = vst [vmem:[%s1852_s2 + $0x1c8] sm:$0xff] %v1667_v18 }
 0x127   :  { %v681_v54 = vadd.f32 %v680_v38, %v1330_v58  ;;  %v832_v44 = vadd.f32 %v831_v41, %v760_v37  ;;  %v1649_v58 = vpop.f32.mrf.mxu3  ;;  %v770_v37 = vmul.f32 %v1485_v42, %v1485_v42 }
 0x128   :  { %650 = vst [vmem:[%s1852_s2 + $0x210] sm:$0xff] %v1649_v58 }
 0x129   :  { %v682_v56 = vadd.f32 %v681_v54, %v1345_v0  ;;  %v833_v57 = vadd.f32 %v832_v44, %v761_v46  ;;  %v771_v46 = vmul.f32 %v1500_v45, %v1500_v45 }
 0x12b   :  { %v683_v59 = vadd.f32 %v682_v56, %v1368_v8  ;;  %v834_v60 = vadd.f32 %v833_v57, %v762_v55  ;;  %v765_v8 = vmul.f32 %v1406_v21, %v1406_v21 }
 0x12d   :  { %v835_v0 = vadd.f32 %v834_v60, %v763_v51  ;;  %v684_v4 = vadd.f32 %v683_v59, %v1383_v14  ;;  %v767_v14 = vmul.f32 %v1440_v32, %v1440_v32  ;;  %v1691_v44 = vpop.f32.mrf.mxu2  ;;  %v773_v51 = vmul.f32 %v1544_v63, %v1544_v63 }
 0x12e   :  { %642 = vst [vmem:[%s1852_s2 + $0x1d0] sm:$0xff] %v1691_v44 }
 0x12f   :  { %v685_v9 = vadd.f32 %v684_v4, %v1406_v21  ;;  %v836_v10 = vadd.f32 %v835_v0, %v764_v2  ;;  %v1673_v21 = vpop.f32.mrf.mxu3  ;;  %v774_v2 = vmul.f32 %v1565_v23, %v1565_v23  ;;  %v775_v4 = vmul.f32 %v1586_v1, %v1586_v1 }
 0x130   :  { %651 = vst [vmem:[%s1852_s2 + $0x218] sm:$0xff] %v1673_v21 }
 0x131   :  { %v686_v13 = vadd.f32 %v685_v9, %v1421_v24  ;;  %v837_v15 = vadd.f32 %v836_v10, %v765_v8  ;;  %v776_v9 = vmul.f32 %v1335_v61, %v1335_v61 }
 0x133   :  { %v687_v16 = vadd.f32 %v686_v13, %v1440_v32  ;;  %v838_v26 = vadd.f32 %v837_v15, %v766_v12  ;;  %v769_v32 = vmul.f32 %v1470_v39, %v1470_v39  ;;  %v778_v15 = vmul.f32 %v1373_v11, %v1373_v11 }
 0x135   :  { %v688_v24 = vadd.f32 %v687_v16, %v1455_v35  ;;  %v839_v20 = vadd.f32 %v838_v26, %v767_v14  ;;  %v1715_v8 = vpop.f32.mrf.mxu2 }
 0x136   :  { %643 = vst [vmem:[%s1852_s2 + $0x1d8] sm:$0xff] %v1715_v8 }
 0x137   :  { %v689_v27 = vadd.f32 %v688_v24, %v1470_v39  ;;  %v840_v28 = vadd.f32 %v839_v20, %v768_v19  ;;  %v1697_v39 = vpop.f32.mrf.mxu3  ;;  %v780_v20 = vmul.f32 %v1411_v22, %v1411_v22 }
 0x138   :  { %652 = vst [vmem:[%s1852_s2 + $0x220] sm:$0xff] %v1697_v39 }
 0x139   :  { %v690_v38 = vadd.f32 %v689_v27, %v1485_v42  ;;  %v841_v41 = vadd.f32 %v840_v28, %v769_v32  ;;  %v772_v42 = vmul.f32 %v1521_v50, %v1521_v50  ;;  %v782_v28 = vmul.f32 %v1445_v33, %v1445_v33 }
 0x13b   :  { %v691_v35 = vadd.f32 %v690_v38, %v1500_v45  ;;  %v842_v54 = vadd.f32 %v841_v41, %v770_v37 }
 0x13d   :  { %v843_v55 = vadd.f32 %v842_v54, %v771_v46  ;;  %v692_v56 = vadd.f32 %v691_v35, %v1521_v50  ;;  %v784_v54 = vmul.f32 %v1475_v40, %v1475_v40 }
 0x13f   :  { %v844_v45 = vadd.f32 %v843_v55, %v772_v42  ;;  %v693_v57 = vadd.f32 %v692_v56, %v1544_v63  ;;  %v1721_v63 = vpop.f32.mrf.mxu3 }
 0x140   :  { %653 = vst [vmem:[%s1852_s2 + $0x228] sm:$0xff] %v1721_v63 }
 0x141   :  { %v845_v59 = vadd.f32 %v844_v45, %v773_v51  ;;  %v694_v60 = vadd.f32 %v693_v57, %v1565_v23 }
 0x143   :  { %v846_v0 = vadd.f32 %v845_v59, %v774_v2  ;;  %v695_v50 = vadd.f32 %v694_v60, %v1586_v1  ;;  %v777_v1 = vmul.f32 %v1350_v3, %v1350_v3  ;;  %v788_v2 = vmul.f32 %v1549_v5, %v1549_v5 }
 0x145   :  { %v696_v23 = vadd.f32 %v695_v50, %v1335_v61  ;;  %v847_v10 = vadd.f32 %v846_v0, %v775_v4  ;;  %v779_v61 = vmul.f32 %v1390_v17, %v1390_v17 }
 0x147   :  { %v697_v12 = vadd.f32 %v696_v23, %v1350_v3  ;;  %v848_v13 = vadd.f32 %v847_v10, %v776_v9  ;;  %v1739_v24 = vpop.f32.mrf.mxu3  ;;  %v790_v9 = vmul.f32 %v1591_v7, %v1591_v7 }
 0x148   :  { %654 = vst [vmem:[%s1852_s2 + $0x230] sm:$0xff] %v1739_v24 }
 0x149   :  { %v698_v14 = vadd.f32 %v697_v12, %v1373_v11  ;;  %v849_v16 = vadd.f32 %v848_v13, %v777_v1  ;;  %v781_v11 = vmul.f32 %v1426_v25, %v1426_v25  ;;  %v791_v1 = vmul.f32 %v1619_v29, %v1619_v29 }
 0x14b   :  { %v699_v26 = vadd.f32 %v698_v14, %v1390_v17  ;;  %v850_v19 = vadd.f32 %v849_v16, %v778_v15 }
 0x14d   :  { %v700_v3 = vadd.f32 %v699_v26, %v1411_v22  ;;  %v851_v32 = vadd.f32 %v850_v19, %v779_v61  ;;  %v783_v22 = vmul.f32 %v1460_v36, %v1460_v36  ;;  %v794_v19 = vmul.f32 %v1691_v44, %v1691_v44 }
 0x14f   :  { %v701_v27 = vadd.f32 %v700_v3, %v1426_v25  ;;  %v852_v17 = vadd.f32 %v851_v32, %v780_v20  ;;  %v1757_v46 = vpop.f32.mrf.mxu3  ;;  %v795_v3 = vmul.f32 %v1715_v8, %v1715_v8 }
 0x150   :  { %655 = vst [vmem:[%s1852_s2 + $0x238] sm:$0xff] %v1757_v46 }
 0x151   :  { %v702_v37 = vadd.f32 %v701_v27, %v1445_v33  ;;  %v853_v38 = vadd.f32 %v852_v17, %v781_v11  ;;  %v785_v33 = vmul.f32 %v1490_v43, %v1490_v43 }
 0x153   :  { %v854_v41 = vadd.f32 %v853_v38, %v782_v28  ;;  %v703_v35 = vadd.f32 %v702_v37, %v1460_v36  ;;  %v786_v36 = vmul.f32 %v1505_v47, %v1505_v47 }
 0x155   :  { %v704_v25 = vadd.f32 %v703_v35, %v1475_v40  ;;  %v855_v55 = vadd.f32 %v854_v41, %v783_v22  ;;  %v787_v40 = vmul.f32 %v1526_v52, %v1526_v52 }
 0x157   :  { %v705_v56 = vadd.f32 %v704_v25, %v1490_v43  ;;  %v856_v42 = vadd.f32 %v855_v55, %v784_v54  ;;  %v1775_v60 = vpop.f32.mrf.mxu3 }
 0x158   :  { %656 = vst [vmem:[%s1852_s2 + $0x240] sm:$0xff] %v1775_v60 }
 0x159   :  { %v706_v45 = vadd.f32 %v705_v56, %v1505_v47  ;;  %v857_v57 = vadd.f32 %v856_v42, %v785_v33  ;;  %v789_v47 = vmul.f32 %v1570_v30, %v1570_v30 }
 0x15b   :  { %v707_v51 = vadd.f32 %v706_v45, %v1526_v52  ;;  %v858_v59 = vadd.f32 %v857_v57, %v786_v36  ;;  %v805_v57 = vmul.f32 %v1721_v63, %v1721_v63 }
 0x15d   :  { %v708_v43 = vadd.f32 %v707_v51, %v1549_v5  ;;  %v859_v0 = vadd.f32 %v858_v59, %v787_v40  ;;  %v806_v59 = vmul.f32 %v1739_v24, %v1739_v24 }
 0x15f   :  { %v709_v50 = vadd.f32 %v708_v43, %v1570_v30  ;;  %v860_v52 = vadd.f32 %v859_v0, %v788_v2  ;;  %v582_v12 = vpop.f32.mrf.mxu3  ;;  %v792_v30 = vmul.f32 %v1643_v49, %v1643_v49  ;;  %v807_v43 = vmul.f32 %v1757_v46, %v1757_v46 }
 0x161   :  { %v710_v4 = vadd.f32 %v709_v50, %v1591_v7  ;;  %v861_v23 = vadd.f32 %v860_v52, %v789_v47  ;;  %v793_v7 = vmul.f32 %v1667_v18, %v1667_v18 }
 0x163   :  { %v862_v10 = vadd.f32 %v861_v23, %v790_v9  ;;  %v711_v5 = vadd.f32 %v710_v4, %v1619_v29 }
 0x165   :  { %v863_v13 = vadd.f32 %v862_v10, %v791_v1  ;;  %v712_v15 = vadd.f32 %v711_v5, %v1643_v49  ;;  %v796_v49 = vmul.f32 %v1511_v48, %v1511_v48 }
 0x167   :  { %v864_v14 = vadd.f32 %v863_v13, %v792_v30  ;;  %v713_v16 = vadd.f32 %v712_v15, %v1667_v18  ;;  %v797_v18 = vmul.f32 %v1532_v53, %v1532_v53 }
 0x169   :  { %v865_v61 = vadd.f32 %v864_v14, %v793_v7  ;;  %v714_v26 = vadd.f32 %v713_v16, %v1691_v44  ;;  %v798_v44 = vmul.f32 %v1555_v6, %v1555_v6 }
 0x16b   :  { %v866_v29 = vadd.f32 %v865_v61, %v794_v19  ;;  %v715_v20 = vadd.f32 %v714_v26, %v1715_v8  ;;  %v799_v8 = vmul.f32 %v1576_v34, %v1576_v34 }
 0x16d   :  { %v716_v32 = vadd.f32 %v715_v20, %v1511_v48  ;;  %v867_v11 = vadd.f32 %v866_v29, %v795_v3  ;;  %v800_v48 = vmul.f32 %v1597_v62, %v1597_v62 }
 0x16f   :  { %v717_v27 = vadd.f32 %v716_v32, %v1532_v53  ;;  %v868_v17 = vadd.f32 %v867_v11, %v796_v49  ;;  %v801_v53 = vmul.f32 %v1625_v31, %v1625_v31 }
 0x171   :  { %v718_v28 = vadd.f32 %v717_v27, %v1555_v6  ;;  %v869_v37 = vadd.f32 %v868_v17, %v797_v18  ;;  %v802_v6 = vmul.f32 %v1649_v58, %v1649_v58 }
 0x173   :  { %v719_v38 = vadd.f32 %v718_v28, %v1576_v34  ;;  %v870_v22 = vadd.f32 %v869_v37, %v798_v44  ;;  %v803_v34 = vmul.f32 %v1673_v21, %v1673_v21 }
 0x175   :  { %v720_v41 = vadd.f32 %v719_v38, %v1597_v62  ;;  %v871_v35 = vadd.f32 %v870_v22, %v799_v8  ;;  %v804_v62 = vmul.f32 %v1697_v39, %v1697_v39 }
 0x177   :  { %v872_v54 = vadd.f32 %v871_v35, %v800_v48  ;;  %v721_v25 = vadd.f32 %v720_v41, %v1625_v31 }
 0x179   :  { %v722_v55 = vadd.f32 %v721_v25, %v1649_v58  ;;  %v873_v33 = vadd.f32 %v872_v54, %v801_v53 }
 0x17b   :  { %v723_v56 = vadd.f32 %v722_v55, %v1673_v21  ;;  %v874_v42 = vadd.f32 %v873_v33, %v802_v6 }
 0x17d   :  { %v724_v36 = vadd.f32 %v723_v56, %v1697_v39  ;;  %v875_v45 = vadd.f32 %v874_v42, %v803_v34  ;;  %v808_v39 = vmul.f32 %v1775_v60, %v1775_v60 }
 0x17f   :  { %v725_v31 = vadd.f32 %v724_v36, %v1721_v63  ;;  %v876_v40 = vadd.f32 %v875_v45, %v804_v62 }
 0x181   :  { %v877_v58 = vadd.f32 %v876_v40, %v805_v57  ;;  %v726_v51 = vadd.f32 %v725_v31, %v1739_v24 }
 0x183   :  { %v878_v21 = vadd.f32 %v877_v58, %v806_v59  ;;  %v727_v2 = vadd.f32 %v726_v51, %v1757_v46 }
 0x185   :  { %v879_v0 = vadd.f32 %v878_v21, %v807_v43  ;;  %v728_v47 = vadd.f32 %v727_v2, %v1775_v60 }
 0x187   :  { %v729_v63 = vrot.slane %v728_v47, 4  ;;  %v880_v50 = vadd.f32 %v879_v0, %v808_v39 }
 0x189   :  { %v730_v52 = vadd.f32 %v729_v63, %v728_v47  ;;  %v881_v4 = vrot.slane %v880_v50, 4 }
 0x18b   :  { %v731_v9 = vrot.slane %v730_v52, 2  ;;  %v882_v23 = vadd.f32 %v881_v4, %v880_v50 }
 0x18d   :  { %v732_v10 = vadd.f32 %v731_v9, %v730_v52  ;;  %v883_v24 = vrot.slane %v882_v23, 2 }
 0x18f   :  { %v733_v5 = vrot.slane %v732_v10, 1  ;;  %v884_v1 = vadd.f32 %v883_v24, %v882_v23 }
 0x191   :  { %v734_v12 = vadd.f32 %v733_v5, %v732_v10  ;;  %v885_v13 = vrot.slane %v884_v1, 1 }
 0x193   :  { %735 = vst [vmem:[%s1853_s3] sm:$0x1] %v734_v12  ;;  %v886_v46 = vadd.f32 %v885_v13, %v884_v1 }
 0x195   :  { %887 = vst [vmem:[%s1854_s4] sm:$0x1] %v886_v46 }

</bundles_post_ra>
